<compile_context>
chip_gen: v6e
topology: v6e:2x2x1
jax: 0.10.0
libtpu: 0.0.40
codegen_flags: <defaults>
</compile_context>

<pallas_src>
import functools
import math

import jax
import jax.numpy as jnp
import numpy as np
from jax.experimental import pallas as pl
from jax.experimental.pallas import tpu as pltpu


# ------------------------------ config ------------------------------

class KoopaConfig:
    seq_len = 16        # lookback length L
    pred_len = 8        # forecast horizon S
    seg_len = 4         # segment length -> freq = 4 input segments, step = 2 output segments
    enc_in = 4          # number of channels C
    dynamic_dim = 16    # Koopman embedding dim H
    hidden_dim = 32     # MLP hidden dim
    hidden_layers = 2
    num_blocks = 2
    alpha = 0.2
    # TODO(synk): exp_koopa computes mask_spectrum data-driven (top-alpha FFT amplitudes of the
    # training set); a deterministic stand-in (DC bin) is used here.
    mask_spectrum = (0,)


CFG = KoopaConfig()

# kernel-ready weight arrays, in the order they are passed to the kernel (after the constants)
WEIGHT_ARG_NAMES = (
    "w_inv1_T", "b_inv1", "w_inv2_T", "b_inv2",
    "w_invd1_T", "b_invd1", "w_invd2_T", "b_invd2", "k_T",
    "w_ve1", "b_ve1", "w_ve2", "b_ve2",
    "w_vd1", "b_vd1", "w_vd2", "b_vd2",
)


# ------------------------------ the fused Pallas kernel ------------------------------

def _koopa_kernel(x_ref,
                  cf_ref, prec_ref, ppred_ref, selfm_ref, permbm_ref,
                  w_i1_ref, b_i1_ref, w_i2_ref, b_i2_ref,
                  w_d1_ref, b_d1_ref, w_d2_ref, b_d2_ref, kT_ref,
                  w_v1_ref, b_v1_ref, w_v2_ref, b_v2_ref,
                  w_w1_ref, b_w1_ref, w_w2_ref, b_w2_ref,
                  out_ref, *, B, C, L, S, SEG, FREQ, STEP, NB):
    f32 = jnp.float32
    BC = B * C

    def mm(a, b):
        return jnp.dot(a, b, preferred_element_type=f32)

    def rowdot(a, b):      # (B, H) x (B, H) -> (B, 1)  per-batch inner product
        return jnp.sum(a * b, axis=1, keepdims=True)

    # ---- series stationarization: time along sublanes, columns are (batch, channel) ----
    xt = x_ref[...]                                           # (L, B*C)
    mean = jnp.mean(xt, axis=0, keepdims=True)                # (1, B*C)
    xc = xt - mean
    std = jnp.sqrt(jnp.mean(xc * xc, axis=0, keepdims=True) + 1e-5)
    residual = xc / std                                       # (L, B*C)
    forecast = jnp.zeros((S, BC), f32)

    for blk in range(NB):                                     # NB = 2 -> fully unrolled
        # ---------------- time-invariant Koopman predictor (transposed orientation) ----------
        # Fourier filter folded at init: w_i1 = W1^T @ (I - F), so it consumes `residual` directly.
        r = jnp.maximum(mm(w_i1_ref[...], residual) + b_i1_ref[...], 0.0)   # (hid, B*C)
        r = mm(w_i2_ref[...], r) + b_i2_ref[...]                            # (H,   B*C)
        r = mm(kT_ref[blk], r)                                              # (H,   B*C)
        r = jnp.maximum(mm(w_d1_ref[...], r) + b_d1_ref[...], 0.0)          # (hid, B*C)
        inv_out = mm(w_d2_ref[...], r) + b_d2_ref[...]                      # (S,   B*C)

        # ---------------- time-variant path: filter + segmentation as ONE constant matmul -----
        bt = mm(cf_ref[...], residual)                 # (SEG*FREQ, B*C), bt[t*FREQ+f, b*C+c]
        seg_rows = []
        for b in range(B):
            cols = [bt[t * FREQ:(t + 1) * FREQ, b * C:(b + 1) * C] for t in range(SEG)]
            seg_rows.append(jnp.concatenate(cols, axis=1))
        segs = jnp.concatenate(seg_rows, axis=0)       # (B*FREQ, SEG*C), segs[b*FREQ+f, t*C+c]

        z = jnp.tanh(mm(segs, w_v1_ref[...]) + b_v1_ref[...])
        z = mm(z, w_v2_ref[...]) + b_v2_ref[...]       # (B*FREQ, H)

        # ---------------- one-step DMD, batched over B (values only, no scratch refs) ---------
        # TODO(synk): torch.linalg.lstsq replaced by a ridge-regularized 3x3 Cramer solve
        # (specialized to freq-1 == 3 snapshots); the Koopman operator K is never materialized.
        zf = mm(selfm_ref[...], z)                     # (FREQ*B, H), f-major reordering
        Z = [zf[i * B:(i + 1) * B, :] for i in range(FREQ)]      # snapshots, each (B, H)
        X = Z[:FREQ - 1]
        Y = Z[1:]
        g00 = rowdot(X[0], X[0]); g01 = rowdot(X[0], X[1]); g02 = rowdot(X[0], X[2])
        g11 = rowdot(X[1], X[1]); g12 = rowdot(X[1], X[2]); g22 = rowdot(X[2], X[2])
        ridge = 1e-4 * (g00 + g11 + g22) * (1.0 / 3.0) + 1e-6     # trace-scaled ridge
        a00 = g00 + ridge; a11 = g11 + ridge; a22 = g22 + ridge
        a01 = g01; a02 = g02; a12 = g12
        c00 = a11 * a22 - a12 * a12
        c01 = a02 * a12 - a01 * a22
        c02 = a01 * a12 - a02 * a11
        c11 = a00 * a22 - a02 * a02
        c12 = a01 * a02 - a00 * a12
        c22 = a00 * a11 - a01 * a01
        inv_det = 1.0 / (a00 * c00 + a01 * c01 + a02 * c02)      # (B, 1)
        t0 = (c00 * Y[0] + c01 * Y[1] + c02 * Y[2]) * inv_det    # rows of (G + rI)^{-1} Y, (B, H)
        t1 = (c01 * Y[0] + c11 * Y[1] + c12 * Y[2]) * inv_det
        t2 = (c02 * Y[0] + c12 * Y[1] + c22 * Y[2]) * inv_det
        # reconstruction  x @ K = (x x^T) @ T, computed row-wise with the (un-ridged) Gram
        rec0 = g00 * t0 + g01 * t1 + g02 * t2
        rec1 = g01 * t0 + g11 * t1 + g12 * t2
        rec2 = g02 * t0 + g12 * t1 + g22 * t2
        # iterative forecast rollout: p <- (p @ x^T) @ T, all batches at once
        p = Z[FREQ - 1]
        preds = []
        for _ in range(STEP):
            pw0 = rowdot(p, X[0]); pw1 = rowdot(p, X[1]); pw2 = rowdot(p, X[2])
            p = pw0 * t0 + pw1 * t1 + pw2 * t2
            preds.append(p)

        zall_f = jnp.concatenate([Z[0], rec0, rec1, rec2] + preds, axis=0)  # ((FREQ+STEP)*B, H)
        zall = mm(permbm_ref[...], zall_f)    # -> [rec rows b-major ; pred rows b-major]

        # ---------------- shared time-variant decoder on reconstruction ++ prediction ---------
        dz = jnp.tanh(mm(zall, w_w1_ref[...]) + b_w1_ref[...])
        dz = mm(dz, w_w2_ref[...]) + b_w2_ref[...]             # (B*(FREQ+STEP), SEG*C)
        dz_rec = dz[:B * FREQ, :]                              # [b*FREQ+f, t*C+c]
        dz_pred = dz[B * FREQ:, :]                             # [b*STEP+s, t*C+c]

        # ---------------- un-segmentation back to the (time, batch*channel) layout ------------
        m_rec_rows = []
        m_pred_rows = []
        for t in range(SEG):
            m_rec_rows.append(jnp.concatenate(
                [dz_rec[b * FREQ:(b + 1) * FREQ, t * C:(t + 1) * C] for b in range(B)], axis=1))
            m_pred_rows.append(jnp.concatenate(
                [dz_pred[b * STEP:(b + 1) * STEP, t * C:(t + 1) * C] for b in range(B)], axis=1))
        m_rec = jnp.concatenate(m_rec_rows, axis=0)            # (SEG*FREQ, B*C)
        m_pred = jnp.concatenate(m_pred_rows, axis=0)          # (SEG*STEP, B*C)
        x_rec = mm(prec_ref[...], m_rec)                       # (L, B*C) backcast
        x_pred = mm(ppred_ref[...], m_pred)                    # (S, B*C) time-variant forecast

        residual = residual - x_rec
        forecast = forecast + inv_out + x_pred

    # ---- de-stationarization; single full-tile store in the lane-friendly (S, B*C) layout ----
    out_ref[...] = forecast * std + mean


# ------------------------------ init-time constants & parameters ------------------------------

def _fourier_filter_matrix(L, mask_spectrum):
    # x_var = irfft(mask * rfft(x, time)) is linear along time -> fold into a real (L, L) matrix F
    eye = np.eye(L, dtype=np.float64)
    xf = np.fft.rfft(eye, axis=0)                       # (L//2+1, L) complex
    mask = np.ones((L // 2 + 1, 1))
    mask[list(mask_spectrum), :] = 0.0
    return np.fft.irfft(xf * mask, n=L, axis=0).astype(np.float32)   # x_var_col = F @ x_col


def _layout_constants(L, S, SEG, FREQ, STEP, F):
    # CF: filter + segment-selection, rows ordered t*FREQ+f so (b, t) blocks are contiguous
    cf_all = np.zeros((SEG * FREQ, L), np.float32)
    p_rec = np.zeros((L, SEG * FREQ), np.float32)
    for t in range(SEG):
        for f in range(FREQ):
            cf_all[t * FREQ + f, :] = F[f * SEG + t, :]
            p_rec[f * SEG + t, t * FREQ + f] = 1.0
    p_pred = np.zeros((S, SEG * STEP), np.float32)
    for t in range(SEG):
        for s in range(STEP):
            j = s * SEG + t
            if j < S:
                p_pred[j, t * STEP + s] = 1.0
    return cf_all, p_rec, p_pred


def _batch_constants(B, FREQ, STEP):
    sel_fm = np.zeros((FREQ * B, B * FREQ), np.float32)       # b-major rows -> f-major rows
    for b in range(B):
        for f in range(FREQ):
            sel_fm[f * B + b, b * FREQ + f] = 1.0
    FS = FREQ + STEP
    perm_bm = np.zeros((B * FS, B * FS), np.float32)          # f-major rows -> [rec b-major ; pred b-major]
    for b in range(B):
        for f in range(FREQ):
            perm_bm[b * FREQ + f, f * B + b] = 1.0
        for s in range(STEP):
            perm_bm[B * FREQ + b * STEP + s, (FREQ + s) * B + b] = 1.0
    return sel_fm, perm_bm


def init_raw_params(key):
    cfg = CFG
    H, hid = cfg.dynamic_dim, cfg.hidden_dim
    L, S, C, seg = cfg.seq_len, cfg.pred_len, cfg.enc_in, cfg.seg_len
    keys = iter(jax.random.split(key, 32))

    def lin(fin, fout):
        lim = 1.0 / math.sqrt(fin)
        w = jax.random.uniform(next(keys), (fin, fout), jnp.float32, -lim, lim)
        b = jax.random.uniform(next(keys), (fout,), jnp.float32, -lim, lim)
        return w, b

    p = {}
    # shared time-invariant MLP encoder/decoder (ReLU, hidden_layers=2 -> 2 Linear layers)
    p["inv_enc_w1"], p["inv_enc_b1"] = lin(L, hid)
    p["inv_enc_w2"], p["inv_enc_b2"] = lin(hid, H)
    p["inv_dec_w1"], p["inv_dec_b1"] = lin(H, hid)
    p["inv_dec_w2"], p["inv_dec_b2"] = lin(hid, S)
    # shared time-variant MLP encoder/decoder (Tanh)
    p["var_enc_w1"], p["var_enc_b1"] = lin(seg * C, hid)
    p["var_enc_w2"], p["var_enc_b2"] = lin(hid, H)
    p["var_dec_w1"], p["var_dec_b1"] = lin(H, hid)
    p["var_dec_w2"], p["var_dec_b2"] = lin(hid, seg * C)
    # per-block learnable Koopman operator (orthogonal init, like U @ V^T of a randn SVD)
    Ks = []
    for _ in range(cfg.num_blocks):
        m = jax.random.normal(next(keys), (H, H), jnp.float32)
        q, _ = jnp.linalg.qr(m)
        Ks.append(q)
    p["K"] = jnp.stack(Ks)                                   # (num_blocks, H, H), applied x -> x @ K
    return p


def prepare_params(raw):
    """Fold constant operators and pre-transpose weights once, at init time."""
    cfg = CFG
    L, S, seg = cfg.seq_len, cfg.pred_len, cfg.seg_len
    freq = L // seg
    step = math.ceil(S / seg)
    F = _fourier_filter_matrix(L, cfg.mask_spectrum)
    cf_all, p_rec, p_pred = _layout_constants(L, S, seg, freq, step, F)
    i_minus_f = jnp.asarray(np.eye(L, dtype=np.float32) - F)

    kp = {
        "cf_all": jnp.asarray(cf_all),
        "p_rec": jnp.asarray(p_rec),
        "p_pred": jnp.asarray(p_pred),
        # time-invariant path, transposed orientation; Fourier filter folded into the 1st layer
        "w_inv1_T": jnp.dot(raw["inv_enc_w1"].T, i_minus_f),        # (hid, L)
        "b_inv1": raw["inv_enc_b1"].reshape(-1, 1),
        "w_inv2_T": raw["inv_enc_w2"].T,                            # (H, hid)
        "b_inv2": raw["inv_enc_b2"].reshape(-1, 1),
        "w_invd1_T": raw["inv_dec_w1"].T,                           # (hid, H)
        "b_invd1": raw["inv_dec_b1"].reshape(-1, 1),
        "w_invd2_T": raw["inv_dec_w2"].T,                           # (S, hid)
        "b_invd2": raw["inv_dec_b2"].reshape(-1, 1),
        "k_T": jnp.transpose(raw["K"], (0, 2, 1)),                  # (NB, H, H)
        # time-variant path, natural orientation
        "w_ve1": raw["var_enc_w1"], "b_ve1": raw["var_enc_b1"].reshape(1, -1),
        "w_ve2": raw["var_enc_w2"], "b_ve2": raw["var_enc_b2"].reshape(1, -1),
        "w_vd1": raw["var_dec_w1"], "b_vd1": raw["var_dec_b1"].reshape(1, -1),
        "w_vd2": raw["var_dec_w2"], "b_vd2": raw["var_dec_b2"].reshape(1, -1),
    }
    return kp


# ------------------------------ forward (single fused pallas_call) ------------------------

def net_forward(kparams, x_seq, x_mark=None):
    # x_mark mirrors net.forward(x_seq, x_mark) but is unused by Koopa's forecast.
    cfg = CFG
    B, L, C = x_seq.shape
    S, seg, nb = cfg.pred_len, cfg.seg_len, cfg.num_blocks
    # TODO(synk): replicate-padding branch of TimeVarKP (seq_len % seg_len != 0) not implemented.
    assert L % seg == 0, "padding path not implemented"
    freq = L // seg
    step = math.ceil(S / seg)
    assert freq - 1 == 3, "in-kernel Cramer solve is specialized to a 3x3 Gram matrix"

    sel_fm, perm_bm = _batch_constants(B, freq, step)

    # lane-friendly time-major slab: x_T[l, b*C + c] = x[b, l, c]   (layout plumbing stays in XLA)
    x_t = jnp.reshape(jnp.transpose(jnp.asarray(x_seq, jnp.float32), (1, 0, 2)), (L, B * C))

    kern = functools.partial(
        _koopa_kernel, B=B, C=C, L=L, S=S, SEG=seg, FREQ=freq, STEP=step, NB=nb)

    args = [x_t, kparams["cf_all"], kparams["p_rec"], kparams["p_pred"],
            jnp.asarray(sel_fm), jnp.asarray(perm_bm)]
    args += [kparams[name] for name in WEIGHT_ARG_NAMES]

    out_t = pl.pallas_call(
        kern,
        out_shape=jax.ShapeDtypeStruct((S, B * C), jnp.float32),
        in_specs=[pl.BlockSpec(memory_space=pltpu.MemorySpace.VMEM)] * len(args),
        out_specs=pl.BlockSpec(memory_space=pltpu.MemorySpace.VMEM),
    )(*args)

    # (S, B*C) -> (B, S, C)
    return jnp.transpose(jnp.reshape(out_t, (S, B, C)), (1, 0, 2))


# ------------------------------ main ------------------------------

if __name__ == "__main__":
    key = jax.random.PRNGKey(0)
    kx, km, kp = jax.random.split(key, 3)
    B = 2
    x_seq = jax.random.normal(kx, (B, CFG.seq_len, CFG.enc_in), jnp.float32)
    x_mark = jax.random.normal(km, (B, CFG.seq_len, 4), jnp.float32)  # time features (unused)

    raw_params = init_raw_params(kp)
    kparams = prepare_params(raw_params)          # constant folding / pre-transposition at init

    fwd = jax.jit(net_forward)
    out = jax.block_until_ready(fwd(kparams, x_seq, x_mark))

    assert out.shape == (B, CFG.pred_len, CFG.enc_in), out.shape
    assert bool(jnp.all(jnp.isfinite(out)))
    print("KERNEL_OK")
</pallas_src>

<mosaic_0001>
module attributes {stable_mosaic.version = 11 : i64} {
  func.func @_koopa_kernel(%arg0: memref<16x8xf32, #tpu.memory_space<vmem>>, %arg1: memref<16x16xf32, #tpu.memory_space<vmem>>, %arg2: memref<16x16xf32, #tpu.memory_space<vmem>>, %arg3: memref<8x8xf32, #tpu.memory_space<vmem>>, %arg4: memref<8x8xf32, #tpu.memory_space<vmem>>, %arg5: memref<12x12xf32, #tpu.memory_space<vmem>>, %arg6: memref<32x16xf32, #tpu.memory_space<vmem>>, %arg7: memref<32x1xf32, #tpu.memory_space<vmem>>, %arg8: memref<16x32xf32, #tpu.memory_space<vmem>>, %arg9: memref<16x1xf32, #tpu.memory_space<vmem>>, %arg10: memref<32x16xf32, #tpu.memory_space<vmem>>, %arg11: memref<32x1xf32, #tpu.memory_space<vmem>>, %arg12: memref<8x32xf32, #tpu.memory_space<vmem>>, %arg13: memref<8x1xf32, #tpu.memory_space<vmem>>, %arg14: memref<2x16x16xf32, #tpu.memory_space<vmem>>, %arg15: memref<16x32xf32, #tpu.memory_space<vmem>>, %arg16: memref<1x32xf32, #tpu.memory_space<vmem>>, %arg17: memref<32x16xf32, #tpu.memory_space<vmem>>, %arg18: memref<1x16xf32, #tpu.memory_space<vmem>>, %arg19: memref<16x32xf32, #tpu.memory_space<vmem>>, %arg20: memref<1x32xf32, #tpu.memory_space<vmem>>, %arg21: memref<32x16xf32, #tpu.memory_space<vmem>>, %arg22: memref<1x16xf32, #tpu.memory_space<vmem>>, %arg23: memref<8x8xf32, #tpu.memory_space<vmem>>) attributes {dimension_semantics = [], scalar_prefetch = 0 : i64, scratch_operands = 0 : i64, tpu.core_type = #tpu.core_type<tc>} {
    %c0 = arith.constant 0 : index
    %c0_0 = arith.constant 0 : index
    %0 = vector.load %arg0[%c0, %c0_0] : memref<16x8xf32, #tpu.memory_space<vmem>>, vector<16x8xf32>
    %cst = arith.constant dense<0.000000e+00> : vector<8xf32>
    %1 = vector.multi_reduction <add>, %0, %cst [0] : vector<16x8xf32> to vector<8xf32>
    %2 = vector.shape_cast %1 : vector<8xf32> to vector<1x8xf32>
    %cst_1 = arith.constant 1.600000e+01 : f32
    %3 = vector.broadcast %cst_1 : f32 to vector<1x8xf32>
    %4 = arith.divf %2, %3 : vector<1x8xf32>
    %5 = vector.broadcast %4 : vector<1x8xf32> to vector<16x8xf32>
    %6 = arith.subf %0, %5 : vector<16x8xf32>
    %7 = arith.mulf %6, %6 : vector<16x8xf32>
    %cst_2 = arith.constant dense<0.000000e+00> : vector<8xf32>
    %8 = vector.multi_reduction <add>, %7, %cst_2 [0] : vector<16x8xf32> to vector<8xf32>
    %9 = vector.shape_cast %8 : vector<8xf32> to vector<1x8xf32>
    %cst_3 = arith.constant 1.600000e+01 : f32
    %10 = vector.broadcast %cst_3 : f32 to vector<1x8xf32>
    %11 = arith.divf %9, %10 : vector<1x8xf32>
    %cst_4 = arith.constant 9.99999974E-6 : f32
    %12 = vector.broadcast %cst_4 : f32 to vector<1x8xf32>
    %13 = arith.addf %11, %12 : vector<1x8xf32>
    %14 = math.sqrt %13 : vector<1x8xf32>
    %15 = vector.broadcast %14 : vector<1x8xf32> to vector<16x8xf32>
    %16 = arith.divf %6, %15 : vector<16x8xf32>
    %cst_5 = arith.constant 0.000000e+00 : f32
    %17 = vector.broadcast %cst_5 : f32 to vector<8x8xf32>
    %c0_6 = arith.constant 0 : index
    %c0_7 = arith.constant 0 : index
    %18 = vector.load %arg6[%c0_6, %c0_7] : memref<32x16xf32, #tpu.memory_space<vmem>>, vector<32x16xf32>
    %cst_8 = arith.constant dense<0.000000e+00> : vector<32x8xf32>
    %19 = tpu.matmul %18, %16, %cst_8 {dimension_numbers = #tpu.dot_dimension_numbers<[1], [0], [0], [1], [0, 0, 1, 1], [], []>} : vector<32x16xf32>, vector<16x8xf32>, vector<32x8xf32> -> vector<32x8xf32>
    %c0_9 = arith.constant 0 : index
    %c0_10 = arith.constant 0 : index
    %20 = vector.load %arg7[%c0_9, %c0_10] : memref<32x1xf32, #tpu.memory_space<vmem>>, vector<32x1xf32>
    %21 = vector.broadcast %20 : vector<32x1xf32> to vector<32x8xf32>
    %22 = arith.addf %19, %21 : vector<32x8xf32>
    %cst_11 = arith.constant 0.000000e+00 : f32
    %23 = vector.broadcast %cst_11 : f32 to vector<32x8xf32>
    %24 = arith.maximumf %22, %23 : vector<32x8xf32>
    %c0_12 = arith.constant 0 : index
    %c0_13 = arith.constant 0 : index
    %25 = vector.load %arg8[%c0_12, %c0_13] : memref<16x32xf32, #tpu.memory_space<vmem>>, vector<16x32xf32>
    %cst_14 = arith.constant dense<0.000000e+00> : vector<16x8xf32>
    %26 = tpu.matmul %25, %24, %cst_14 {dimension_numbers = #tpu.dot_dimension_numbers<[1], [0], [0], [1], [0, 0, 1, 1], [], []>} : vector<16x32xf32>, vector<32x8xf32>, vector<16x8xf32> -> vector<16x8xf32>
    %c0_15 = arith.constant 0 : index
    %c0_16 = arith.constant 0 : index
    %27 = vector.load %arg9[%c0_15, %c0_16] : memref<16x1xf32, #tpu.memory_space<vmem>>, vector<16x1xf32>
    %28 = vector.broadcast %27 : vector<16x1xf32> to vector<16x8xf32>
    %29 = arith.addf %26, %28 : vector<16x8xf32>
    %c0_17 = arith.constant 0 : index
    %c0_18 = arith.constant 0 : index
    %c0_19 = arith.constant 0 : index
    %30 = vector.load %arg14[%c0_17, %c0_18, %c0_19] : memref<2x16x16xf32, #tpu.memory_space<vmem>>, vector<1x16x16xf32>
    %31 = vector.shape_cast %30 : vector<1x16x16xf32> to vector<16x16xf32>
    %cst_20 = arith.constant dense<0.000000e+00> : vector<16x8xf32>
    %32 = tpu.matmul %31, %29, %cst_20 {dimension_numbers = #tpu.dot_dimension_numbers<[1], [0], [0], [1], [0, 0, 1, 1], [], []>} : vector<16x16xf32>, vector<16x8xf32>, vector<16x8xf32> -> vector<16x8xf32>
    %c0_21 = arith.constant 0 : index
    %c0_22 = arith.constant 0 : index
    %33 = vector.load %arg10[%c0_21, %c0_22] : memref<32x16xf32, #tpu.memory_space<vmem>>, vector<32x16xf32>
    %cst_23 = arith.constant dense<0.000000e+00> : vector<32x8xf32>
    %34 = tpu.matmul %33, %32, %cst_23 {dimension_numbers = #tpu.dot_dimension_numbers<[1], [0], [0], [1], [0, 0, 1, 1], [], []>} : vector<32x16xf32>, vector<16x8xf32>, vector<32x8xf32> -> vector<32x8xf32>
    %c0_24 = arith.constant 0 : index
    %c0_25 = arith.constant 0 : index
    %35 = vector.load %arg11[%c0_24, %c0_25] : memref<32x1xf32, #tpu.memory_space<vmem>>, vector<32x1xf32>
    %36 = vector.broadcast %35 : vector<32x1xf32> to vector<32x8xf32>
    %37 = arith.addf %34, %36 : vector<32x8xf32>
    %cst_26 = arith.constant 0.000000e+00 : f32
    %38 = vector.broadcast %cst_26 : f32 to vector<32x8xf32>
    %39 = arith.maximumf %37, %38 : vector<32x8xf32>
    %c0_27 = arith.constant 0 : index
    %c0_28 = arith.constant 0 : index
    %40 = vector.load %arg12[%c0_27, %c0_28] : memref<8x32xf32, #tpu.memory_space<vmem>>, vector<8x32xf32>
    %cst_29 = arith.constant dense<0.000000e+00> : vector<8x8xf32>
    %41 = tpu.matmul %40, %39, %cst_29 {dimension_numbers = #tpu.dot_dimension_numbers<[1], [0], [0], [1], [0, 0, 1, 1], [], []>} : vector<8x32xf32>, vector<32x8xf32>, vector<8x8xf32> -> vector<8x8xf32>
    %c0_30 = arith.constant 0 : index
    %c0_31 = arith.constant 0 : index
    %42 = vector.load %arg13[%c0_30, %c0_31] : memref<8x1xf32, #tpu.memory_space<vmem>>, vector<8x1xf32>
    %43 = vector.broadcast %42 : vector<8x1xf32> to vector<8x8xf32>
    %44 = arith.addf %41, %43 : vector<8x8xf32>
    %c0_32 = arith.constant 0 : index
    %c0_33 = arith.constant 0 : index
    %45 = vector.load %arg1[%c0_32, %c0_33] : memref<16x16xf32, #tpu.memory_space<vmem>>, vector<16x16xf32>
    %cst_34 = arith.constant dense<0.000000e+00> : vector<16x8xf32>
    %46 = tpu.matmul %45, %16, %cst_34 {dimension_numbers = #tpu.dot_dimension_numbers<[1], [0], [0], [1], [0, 0, 1, 1], [], []>} : vector<16x16xf32>, vector<16x8xf32>, vector<16x8xf32> -> vector<16x8xf32>
    %47 = vector.extract_strided_slice %46 {offsets = [0, 0], sizes = [4, 4], strides = [1, 1]} : vector<16x8xf32> to vector<4x4xf32>
    %48 = vector.extract_strided_slice %46 {offsets = [4, 0], sizes = [4, 4], strides = [1, 1]} : vector<16x8xf32> to vector<4x4xf32>
    %49 = vector.extract_strided_slice %46 {offsets = [8, 0], sizes = [4, 4], strides = [1, 1]} : vector<16x8xf32> to vector<4x4xf32>
    %50 = vector.extract_strided_slice %46 {offsets = [12, 0], sizes = [4, 4], strides = [1, 1]} : vector<16x8xf32> to vector<4x4xf32>
    %51 = tpu.concatenate %47, %48, %49, %50 in 1 : vector<4x4xf32>, vector<4x4xf32>, vector<4x4xf32>, vector<4x4xf32> -> vector<4x16xf32>
    %52 = vector.extract_strided_slice %46 {offsets = [0, 4], sizes = [4, 4], strides = [1, 1]} : vector<16x8xf32> to vector<4x4xf32>
    %53 = vector.extract_strided_slice %46 {offsets = [4, 4], sizes = [4, 4], strides = [1, 1]} : vector<16x8xf32> to vector<4x4xf32>
    %54 = vector.extract_strided_slice %46 {offsets = [8, 4], sizes = [4, 4], strides = [1, 1]} : vector<16x8xf32> to vector<4x4xf32>
    %55 = vector.extract_strided_slice %46 {offsets = [12, 4], sizes = [4, 4], strides = [1, 1]} : vector<16x8xf32> to vector<4x4xf32>
    %56 = tpu.concatenate %52, %53, %54, %55 in 1 : vector<4x4xf32>, vector<4x4xf32>, vector<4x4xf32>, vector<4x4xf32> -> vector<4x16xf32>
    %57 = tpu.concatenate %51, %56 in 0 : vector<4x16xf32>, vector<4x16xf32> -> vector<8x16xf32>
    %c0_35 = arith.constant 0 : index
    %c0_36 = arith.constant 0 : index
    %58 = vector.load %arg15[%c0_35, %c0_36] : memref<16x32xf32, #tpu.memory_space<vmem>>, vector<16x32xf32>
    %cst_37 = arith.constant dense<0.000000e+00> : vector<8x32xf32>
    %59 = tpu.matmul %57, %58, %cst_37 {dimension_numbers = #tpu.dot_dimension_numbers<[1], [0], [0], [1], [0, 0, 1, 1], [], []>} : vector<8x16xf32>, vector<16x32xf32>, vector<8x32xf32> -> vector<8x32xf32>
    %c0_38 = arith.constant 0 : index
    %c0_39 = arith.constant 0 : index
    %60 = vector.load %arg16[%c0_38, %c0_39] : memref<1x32xf32, #tpu.memory_space<vmem>>, vector<1x32xf32>
    %61 = vector.broadcast %60 : vector<1x32xf32> to vector<8x32xf32>
    %62 = arith.addf %59, %61 : vector<8x32xf32>
    %63 = math.tanh %62 : vector<8x32xf32>
    %c0_40 = arith.constant 0 : index
    %c0_41 = arith.constant 0 : index
    %64 = vector.load %arg17[%c0_40, %c0_41] : memref<32x16xf32, #tpu.memory_space<vmem>>, vector<32x16xf32>
    %cst_42 = arith.constant dense<0.000000e+00> : vector<8x16xf32>
    %65 = tpu.matmul %63, %64, %cst_42 {dimension_numbers = #tpu.dot_dimension_numbers<[1], [0], [0], [1], [0, 0, 1, 1], [], []>} : vector<8x32xf32>, vector<32x16xf32>, vector<8x16xf32> -> vector<8x16xf32>
    %c0_43 = arith.constant 0 : index
    %c0_44 = arith.constant 0 : index
    %66 = vector.load %arg18[%c0_43, %c0_44] : memref<1x16xf32, #tpu.memory_space<vmem>>, vector<1x16xf32>
    %67 = vector.broadcast %66 : vector<1x16xf32> to vector<8x16xf32>
    %68 = arith.addf %65, %67 : vector<8x16xf32>
    %c0_45 = arith.constant 0 : index
    %c0_46 = arith.constant 0 : index
    %69 = vector.load %arg4[%c0_45, %c0_46] : memref<8x8xf32, #tpu.memory_space<vmem>>, vector<8x8xf32>
    %cst_47 = arith.constant dense<0.000000e+00> : vector<8x16xf32>
    %70 = tpu.matmul %69, %68, %cst_47 {dimension_numbers = #tpu.dot_dimension_numbers<[1], [0], [0], [1], [0, 0, 1, 1], [], []>} : vector<8x8xf32>, vector<8x16xf32>, vector<8x16xf32> -> vector<8x16xf32>
    %71 = vector.extract_strided_slice %70 {offsets = [0, 0], sizes = [2, 16], strides = [1, 1]} : vector<8x16xf32> to vector<2x16xf32>
    %72 = vector.extract_strided_slice %70 {offsets = [2, 0], sizes = [2, 16], strides = [1, 1]} : vector<8x16xf32> to vector<2x16xf32>
    %73 = vector.extract_strided_slice %70 {offsets = [4, 0], sizes = [2, 16], strides = [1, 1]} : vector<8x16xf32> to vector<2x16xf32>
    %74 = vector.extract_strided_slice %70 {offsets = [6, 0], sizes = [2, 16], strides = [1, 1]} : vector<8x16xf32> to vector<2x16xf32>
    %75 = arith.mulf %71, %71 : vector<2x16xf32>
    %cst_48 = arith.constant dense<0.000000e+00> : vector<2xf32>
    %76 = vector.multi_reduction <add>, %75, %cst_48 [1] : vector<2x16xf32> to vector<2xf32>
    %77 = vector.shape_cast %76 : vector<2xf32> to vector<2x1xf32>
    %78 = arith.mulf %71, %72 : vector<2x16xf32>
    %cst_49 = arith.constant dense<0.000000e+00> : vector<2xf32>
    %79 = vector.multi_reduction <add>, %78, %cst_49 [1] : vector<2x16xf32> to vector<2xf32>
    %80 = vector.shape_cast %79 : vector<2xf32> to vector<2x1xf32>
    %81 = arith.mulf %71, %73 : vector<2x16xf32>
    %cst_50 = arith.constant dense<0.000000e+00> : vector<2xf32>
    %82 = vector.multi_reduction <add>, %81, %cst_50 [1] : vector<2x16xf32> to vector<2xf32>
    %83 = vector.shape_cast %82 : vector<2xf32> to vector<2x1xf32>
    %84 = arith.mulf %72, %72 : vector<2x16xf32>
    %cst_51 = arith.constant dense<0.000000e+00> : vector<2xf32>
    %85 = vector.multi_reduction <add>, %84, %cst_51 [1] : vector<2x16xf32> to vector<2xf32>
    %86 = vector.shape_cast %85 : vector<2xf32> to vector<2x1xf32>
    %87 = arith.mulf %72, %73 : vector<2x16xf32>
    %cst_52 = arith.constant dense<0.000000e+00> : vector<2xf32>
    %88 = vector.multi_reduction <add>, %87, %cst_52 [1] : vector<2x16xf32> to vector<2xf32>
    %89 = vector.shape_cast %88 : vector<2xf32> to vector<2x1xf32>
    %90 = arith.mulf %73, %73 : vector<2x16xf32>
    %cst_53 = arith.constant dense<0.000000e+00> : vector<2xf32>
    %91 = vector.multi_reduction <add>, %90, %cst_53 [1] : vector<2x16xf32> to vector<2xf32>
    %92 = vector.shape_cast %91 : vector<2xf32> to vector<2x1xf32>
    %93 = arith.addf %77, %86 : vector<2x1xf32>
    %94 = arith.addf %93, %92 : vector<2x1xf32>
    %cst_54 = arith.constant 9.99999974E-5 : f32
    %95 = vector.broadcast %cst_54 : f32 to vector<2x1xf32>
    %96 = arith.mulf %95, %94 : vector<2x1xf32>
    %cst_55 = arith.constant 0.333333343 : f32
    %97 = vector.broadcast %cst_55 : f32 to vector<2x1xf32>
    %98 = arith.mulf %96, %97 : vector<2x1xf32>
    %cst_56 = arith.constant 9.99999997E-7 : f32
    %99 = vector.broadcast %cst_56 : f32 to vector<2x1xf32>
    %100 = arith.addf %98, %99 : vector<2x1xf32>
    %101 = arith.addf %77, %100 : vector<2x1xf32>
    %102 = arith.addf %86, %100 : vector<2x1xf32>
    %103 = arith.addf %92, %100 : vector<2x1xf32>
    %104 = arith.mulf %102, %103 : vector<2x1xf32>
    %105 = arith.mulf %89, %89 : vector<2x1xf32>
    %106 = arith.subf %104, %105 : vector<2x1xf32>
    %107 = arith.mulf %83, %89 : vector<2x1xf32>
    %108 = arith.mulf %80, %103 : vector<2x1xf32>
    %109 = arith.subf %107, %108 : vector<2x1xf32>
    %110 = arith.mulf %80, %89 : vector<2x1xf32>
    %111 = arith.mulf %83, %102 : vector<2x1xf32>
    %112 = arith.subf %110, %111 : vector<2x1xf32>
    %113 = arith.mulf %101, %103 : vector<2x1xf32>
    %114 = arith.mulf %83, %83 : vector<2x1xf32>
    %115 = arith.subf %113, %114 : vector<2x1xf32>
    %116 = arith.mulf %80, %83 : vector<2x1xf32>
    %117 = arith.mulf %101, %89 : vector<2x1xf32>
    %118 = arith.subf %116, %117 : vector<2x1xf32>
    %119 = arith.mulf %101, %102 : vector<2x1xf32>
    %120 = arith.mulf %80, %80 : vector<2x1xf32>
    %121 = arith.subf %119, %120 : vector<2x1xf32>
    %122 = arith.mulf %101, %106 : vector<2x1xf32>
    %123 = arith.mulf %80, %109 : vector<2x1xf32>
    %124 = arith.addf %122, %123 : vector<2x1xf32>
    %125 = arith.mulf %83, %112 : vector<2x1xf32>
    %126 = arith.addf %124, %125 : vector<2x1xf32>
    %cst_57 = arith.constant 1.000000e+00 : f32
    %127 = vector.broadcast %cst_57 : f32 to vector<2x1xf32>
    %128 = arith.divf %127, %126 : vector<2x1xf32>
    %129 = vector.broadcast %106 : vector<2x1xf32> to vector<2x16xf32>
    %130 = arith.mulf %129, %72 : vector<2x16xf32>
    %131 = vector.broadcast %109 : vector<2x1xf32> to vector<2x16xf32>
    %132 = arith.mulf %131, %73 : vector<2x16xf32>
    %133 = arith.addf %130, %132 : vector<2x16xf32>
    %134 = vector.broadcast %112 : vector<2x1xf32> to vector<2x16xf32>
    %135 = arith.mulf %134, %74 : vector<2x16xf32>
    %136 = arith.addf %133, %135 : vector<2x16xf32>
    %137 = vector.broadcast %128 : vector<2x1xf32> to vector<2x16xf32>
    %138 = arith.mulf %136, %137 : vector<2x16xf32>
    %139 = vector.broadcast %109 : vector<2x1xf32> to vector<2x16xf32>
    %140 = arith.mulf %139, %72 : vector<2x16xf32>
    %141 = vector.broadcast %115 : vector<2x1xf32> to vector<2x16xf32>
    %142 = arith.mulf %141, %73 : vector<2x16xf32>
    %143 = arith.addf %140, %142 : vector<2x16xf32>
    %144 = vector.broadcast %118 : vector<2x1xf32> to vector<2x16xf32>
    %145 = arith.mulf %144, %74 : vector<2x16xf32>
    %146 = arith.addf %143, %145 : vector<2x16xf32>
    %147 = vector.broadcast %128 : vector<2x1xf32> to vector<2x16xf32>
    %148 = arith.mulf %146, %147 : vector<2x16xf32>
    %149 = vector.broadcast %112 : vector<2x1xf32> to vector<2x16xf32>
    %150 = arith.mulf %149, %72 : vector<2x16xf32>
    %151 = vector.broadcast %118 : vector<2x1xf32> to vector<2x16xf32>
    %152 = arith.mulf %151, %73 : vector<2x16xf32>
    %153 = arith.addf %150, %152 : vector<2x16xf32>
    %154 = vector.broadcast %121 : vector<2x1xf32> to vector<2x16xf32>
    %155 = arith.mulf %154, %74 : vector<2x16xf32>
    %156 = arith.addf %153, %155 : vector<2x16xf32>
    %157 = vector.broadcast %128 : vector<2x1xf32> to vector<2x16xf32>
    %158 = arith.mulf %156, %157 : vector<2x16xf32>
    %159 = vector.broadcast %77 : vector<2x1xf32> to vector<2x16xf32>
    %160 = arith.mulf %159, %138 : vector<2x16xf32>
    %161 = vector.broadcast %80 : vector<2x1xf32> to vector<2x16xf32>
    %162 = arith.mulf %161, %148 : vector<2x16xf32>
    %163 = arith.addf %160, %162 : vector<2x16xf32>
    %164 = vector.broadcast %83 : vector<2x1xf32> to vector<2x16xf32>
    %165 = arith.mulf %164, %158 : vector<2x16xf32>
    %166 = arith.addf %163, %165 : vector<2x16xf32>
    %167 = vector.broadcast %80 : vector<2x1xf32> to vector<2x16xf32>
    %168 = arith.mulf %167, %138 : vector<2x16xf32>
    %169 = vector.broadcast %86 : vector<2x1xf32> to vector<2x16xf32>
    %170 = arith.mulf %169, %148 : vector<2x16xf32>
    %171 = arith.addf %168, %170 : vector<2x16xf32>
    %172 = vector.broadcast %89 : vector<2x1xf32> to vector<2x16xf32>
    %173 = arith.mulf %172, %158 : vector<2x16xf32>
    %174 = arith.addf %171, %173 : vector<2x16xf32>
    %175 = vector.broadcast %83 : vector<2x1xf32> to vector<2x16xf32>
    %176 = arith.mulf %175, %138 : vector<2x16xf32>
    %177 = vector.broadcast %89 : vector<2x1xf32> to vector<2x16xf32>
    %178 = arith.mulf %177, %148 : vector<2x16xf32>
    %179 = arith.addf %176, %178 : vector<2x16xf32>
    %180 = vector.broadcast %92 : vector<2x1xf32> to vector<2x16xf32>
    %181 = arith.mulf %180, %158 : vector<2x16xf32>
    %182 = arith.addf %179, %181 : vector<2x16xf32>
    %183 = arith.mulf %74, %71 : vector<2x16xf32>
    %cst_58 = arith.constant dense<0.000000e+00> : vector<2xf32>
    %184 = vector.multi_reduction <add>, %183, %cst_58 [1] : vector<2x16xf32> to vector<2xf32>
    %185 = vector.shape_cast %184 : vector<2xf32> to vector<2x1xf32>
    %186 = arith.mulf %74, %72 : vector<2x16xf32>
    %cst_59 = arith.constant dense<0.000000e+00> : vector<2xf32>
    %187 = vector.multi_reduction <add>, %186, %cst_59 [1] : vector<2x16xf32> to vector<2xf32>
    %188 = vector.shape_cast %187 : vector<2xf32> to vector<2x1xf32>
    %189 = arith.mulf %74, %73 : vector<2x16xf32>
    %cst_60 = arith.constant dense<0.000000e+00> : vector<2xf32>
    %190 = vector.multi_reduction <add>, %189, %cst_60 [1] : vector<2x16xf32> to vector<2xf32>
    %191 = vector.shape_cast %190 : vector<2xf32> to vector<2x1xf32>
    %192 = vector.broadcast %185 : vector<2x1xf32> to vector<2x16xf32>
    %193 = arith.mulf %192, %138 : vector<2x16xf32>
    %194 = vector.broadcast %188 : vector<2x1xf32> to vector<2x16xf32>
    %195 = arith.mulf %194, %148 : vector<2x16xf32>
    %196 = arith.addf %193, %195 : vector<2x16xf32>
    %197 = vector.broadcast %191 : vector<2x1xf32> to vector<2x16xf32>
    %198 = arith.mulf %197, %158 : vector<2x16xf32>
    %199 = arith.addf %196, %198 : vector<2x16xf32>
    %200 = arith.mulf %199, %71 : vector<2x16xf32>
    %cst_61 = arith.constant dense<0.000000e+00> : vector<2xf32>
    %201 = vector.multi_reduction <add>, %200, %cst_61 [1] : vector<2x16xf32> to vector<2xf32>
    %202 = vector.shape_cast %201 : vector<2xf32> to vector<2x1xf32>
    %203 = arith.mulf %199, %72 : vector<2x16xf32>
    %cst_62 = arith.constant dense<0.000000e+00> : vector<2xf32>
    %204 = vector.multi_reduction <add>, %203, %cst_62 [1] : vector<2x16xf32> to vector<2xf32>
    %205 = vector.shape_cast %204 : vector<2xf32> to vector<2x1xf32>
    %206 = arith.mulf %199, %73 : vector<2x16xf32>
    %cst_63 = arith.constant dense<0.000000e+00> : vector<2xf32>
    %207 = vector.multi_reduction <add>, %206, %cst_63 [1] : vector<2x16xf32> to vector<2xf32>
    %208 = vector.shape_cast %207 : vector<2xf32> to vector<2x1xf32>
    %209 = vector.broadcast %202 : vector<2x1xf32> to vector<2x16xf32>
    %210 = arith.mulf %209, %138 : vector<2x16xf32>
    %211 = vector.broadcast %205 : vector<2x1xf32> to vector<2x16xf32>
    %212 = arith.mulf %211, %148 : vector<2x16xf32>
    %213 = arith.addf %210, %212 : vector<2x16xf32>
    %214 = vector.broadcast %208 : vector<2x1xf32> to vector<2x16xf32>
    %215 = arith.mulf %214, %158 : vector<2x16xf32>
    %216 = arith.addf %213, %215 : vector<2x16xf32>
    %217 = tpu.concatenate %71, %166, %174, %182, %199, %216 in 0 : vector<2x16xf32>, vector<2x16xf32>, vector<2x16xf32>, vector<2x16xf32>, vector<2x16xf32>, vector<2x16xf32> -> vector<12x16xf32>
    %c0_64 = arith.constant 0 : index
    %c0_65 = arith.constant 0 : index
    %218 = vector.load %arg5[%c0_64, %c0_65] : memref<12x12xf32, #tpu.memory_space<vmem>>, vector<12x12xf32>
    %cst_66 = arith.constant dense<0.000000e+00> : vector<12x16xf32>
    %219 = tpu.matmul %218, %217, %cst_66 {dimension_numbers = #tpu.dot_dimension_numbers<[1], [0], [0], [1], [0, 0, 1, 1], [], []>} : vector<12x12xf32>, vector<12x16xf32>, vector<12x16xf32> -> vector<12x16xf32>
    %c0_67 = arith.constant 0 : index
    %c0_68 = arith.constant 0 : index
    %220 = vector.load %arg19[%c0_67, %c0_68] : memref<16x32xf32, #tpu.memory_space<vmem>>, vector<16x32xf32>
    %cst_69 = arith.constant dense<0.000000e+00> : vector<12x32xf32>
    %221 = tpu.matmul %219, %220, %cst_69 {dimension_numbers = #tpu.dot_dimension_numbers<[1], [0], [0], [1], [0, 0, 1, 1], [], []>} : vector<12x16xf32>, vector<16x32xf32>, vector<12x32xf32> -> vector<12x32xf32>
    %c0_70 = arith.constant 0 : index
    %c0_71 = arith.constant 0 : index
    %222 = vector.load %arg20[%c0_70, %c0_71] : memref<1x32xf32, #tpu.memory_space<vmem>>, vector<1x32xf32>
    %223 = vector.broadcast %222 : vector<1x32xf32> to vector<12x32xf32>
    %224 = arith.addf %221, %223 : vector<12x32xf32>
    %225 = math.tanh %224 : vector<12x32xf32>
    %c0_72 = arith.constant 0 : index
    %c0_73 = arith.constant 0 : index
    %226 = vector.load %arg21[%c0_72, %c0_73] : memref<32x16xf32, #tpu.memory_space<vmem>>, vector<32x16xf32>
    %cst_74 = arith.constant dense<0.000000e+00> : vector<12x16xf32>
    %227 = tpu.matmul %225, %226, %cst_74 {dimension_numbers = #tpu.dot_dimension_numbers<[1], [0], [0], [1], [0, 0, 1, 1], [], []>} : vector<12x32xf32>, vector<32x16xf32>, vector<12x16xf32> -> vector<12x16xf32>
    %c0_75 = arith.constant 0 : index
    %c0_76 = arith.constant 0 : index
    %228 = vector.load %arg22[%c0_75, %c0_76] : memref<1x16xf32, #tpu.memory_space<vmem>>, vector<1x16xf32>
    %229 = vector.broadcast %228 : vector<1x16xf32> to vector<12x16xf32>
    %230 = arith.addf %227, %229 : vector<12x16xf32>
    %231 = vector.extract_strided_slice %230 {offsets = [0, 0], sizes = [8, 16], strides = [1, 1]} : vector<12x16xf32> to vector<8x16xf32>
    %232 = vector.extract_strided_slice %230 {offsets = [8, 0], sizes = [4, 16], strides = [1, 1]} : vector<12x16xf32> to vector<4x16xf32>
    %233 = vector.extract_strided_slice %231 {offsets = [0, 0], sizes = [4, 4], strides = [1, 1]} : vector<8x16xf32> to vector<4x4xf32>
    %234 = vector.extract_strided_slice %231 {offsets = [4, 0], sizes = [4, 4], strides = [1, 1]} : vector<8x16xf32> to vector<4x4xf32>
    %235 = tpu.concatenate %233, %234 in 1 : vector<4x4xf32>, vector<4x4xf32> -> vector<4x8xf32>
    %236 = vector.extract_strided_slice %232 {offsets = [0, 0], sizes = [2, 4], strides = [1, 1]} : vector<4x16xf32> to vector<2x4xf32>
    %237 = vector.extract_strided_slice %232 {offsets = [2, 0], sizes = [2, 4], strides = [1, 1]} : vector<4x16xf32> to vector<2x4xf32>
    %238 = tpu.concatenate %236, %237 in 1 : vector<2x4xf32>, vector<2x4xf32> -> vector<2x8xf32>
    %239 = vector.extract_strided_slice %231 {offsets = [0, 4], sizes = [4, 4], strides = [1, 1]} : vector<8x16xf32> to vector<4x4xf32>
    %240 = vector.extract_strided_slice %231 {offsets = [4, 4], sizes = [4, 4], strides = [1, 1]} : vector<8x16xf32> to vector<4x4xf32>
    %241 = tpu.concatenate %239, %240 in 1 : vector<4x4xf32>, vector<4x4xf32> -> vector<4x8xf32>
    %242 = vector.extract_strided_slice %232 {offsets = [0, 4], sizes = [2, 4], strides = [1, 1]} : vector<4x16xf32> to vector<2x4xf32>
    %243 = vector.extract_strided_slice %232 {offsets = [2, 4], sizes = [2, 4], strides = [1, 1]} : vector<4x16xf32> to vector<2x4xf32>
    %244 = tpu.concatenate %242, %243 in 1 : vector<2x4xf32>, vector<2x4xf32> -> vector<2x8xf32>
    %245 = vector.extract_strided_slice %231 {offsets = [0, 8], sizes = [4, 4], strides = [1, 1]} : vector<8x16xf32> to vector<4x4xf32>
    %246 = vector.extract_strided_slice %231 {offsets = [4, 8], sizes = [4, 4], strides = [1, 1]} : vector<8x16xf32> to vector<4x4xf32>
    %247 = tpu.concatenate %245, %246 in 1 : vector<4x4xf32>, vector<4x4xf32> -> vector<4x8xf32>
    %248 = vector.extract_strided_slice %232 {offsets = [0, 8], sizes = [2, 4], strides = [1, 1]} : vector<4x16xf32> to vector<2x4xf32>
    %249 = vector.extract_strided_slice %232 {offsets = [2, 8], sizes = [2, 4], strides = [1, 1]} : vector<4x16xf32> to vector<2x4xf32>
    %250 = tpu.concatenate %248, %249 in 1 : vector<2x4xf32>, vector<2x4xf32> -> vector<2x8xf32>
    %251 = vector.extract_strided_slice %231 {offsets = [0, 12], sizes = [4, 4], strides = [1, 1]} : vector<8x16xf32> to vector<4x4xf32>
    %252 = vector.extract_strided_slice %231 {offsets = [4, 12], sizes = [4, 4], strides = [1, 1]} : vector<8x16xf32> to vector<4x4xf32>
    %253 = tpu.concatenate %251, %252 in 1 : vector<4x4xf32>, vector<4x4xf32> -> vector<4x8xf32>
    %254 = vector.extract_strided_slice %232 {offsets = [0, 12], sizes = [2, 4], strides = [1, 1]} : vector<4x16xf32> to vector<2x4xf32>
    %255 = vector.extract_strided_slice %232 {offsets = [2, 12], sizes = [2, 4], strides = [1, 1]} : vector<4x16xf32> to vector<2x4xf32>
    %256 = tpu.concatenate %254, %255 in 1 : vector<2x4xf32>, vector<2x4xf32> -> vector<2x8xf32>
    %257 = tpu.concatenate %235, %241, %247, %253 in 0 : vector<4x8xf32>, vector<4x8xf32>, vector<4x8xf32>, vector<4x8xf32> -> vector<16x8xf32>
    %258 = tpu.concatenate %238, %244, %250, %256 in 0 : vector<2x8xf32>, vector<2x8xf32>, vector<2x8xf32>, vector<2x8xf32> -> vector<8x8xf32>
    %c0_77 = arith.constant 0 : index
    %c0_78 = arith.constant 0 : index
    %259 = vector.load %arg2[%c0_77, %c0_78] : memref<16x16xf32, #tpu.memory_space<vmem>>, vector<16x16xf32>
    %cst_79 = arith.constant dense<0.000000e+00> : vector<16x8xf32>
    %260 = tpu.matmul %259, %257, %cst_79 {dimension_numbers = #tpu.dot_dimension_numbers<[1], [0], [0], [1], [0, 0, 1, 1], [], []>} : vector<16x16xf32>, vector<16x8xf32>, vector<16x8xf32> -> vector<16x8xf32>
    %c0_80 = arith.constant 0 : index
    %c0_81 = arith.constant 0 : index
    %261 = vector.load %arg3[%c0_80, %c0_81] : memref<8x8xf32, #tpu.memory_space<vmem>>, vector<8x8xf32>
    %cst_82 = arith.constant dense<0.000000e+00> : vector<8x8xf32>
    %262 = tpu.matmul %261, %258, %cst_82 {dimension_numbers = #tpu.dot_dimension_numbers<[1], [0], [0], [1], [0, 0, 1, 1], [], []>} : vector<8x8xf32>, vector<8x8xf32>, vector<8x8xf32> -> vector<8x8xf32>
    %263 = arith.subf %16, %260 : vector<16x8xf32>
    %264 = arith.addf %17, %44 : vector<8x8xf32>
    %265 = arith.addf %264, %262 : vector<8x8xf32>
    %c0_83 = arith.constant 0 : index
    %c0_84 = arith.constant 0 : index
    %266 = vector.load %arg6[%c0_83, %c0_84] : memref<32x16xf32, #tpu.memory_space<vmem>>, vector<32x16xf32>
    %cst_85 = arith.constant dense<0.000000e+00> : vector<32x8xf32>
    %267 = tpu.matmul %266, %263, %cst_85 {dimension_numbers = #tpu.dot_dimension_numbers<[1], [0], [0], [1], [0, 0, 1, 1], [], []>} : vector<32x16xf32>, vector<16x8xf32>, vector<32x8xf32> -> vector<32x8xf32>
    %c0_86 = arith.constant 0 : index
    %c0_87 = arith.constant 0 : index
    %268 = vector.load %arg7[%c0_86, %c0_87] : memref<32x1xf32, #tpu.memory_space<vmem>>, vector<32x1xf32>
    %269 = vector.broadcast %268 : vector<32x1xf32> to vector<32x8xf32>
    %270 = arith.addf %267, %269 : vector<32x8xf32>
    %cst_88 = arith.constant 0.000000e+00 : f32
    %271 = vector.broadcast %cst_88 : f32 to vector<32x8xf32>
    %272 = arith.maximumf %270, %271 : vector<32x8xf32>
    %c0_89 = arith.constant 0 : index
    %c0_90 = arith.constant 0 : index
    %273 = vector.load %arg8[%c0_89, %c0_90] : memref<16x32xf32, #tpu.memory_space<vmem>>, vector<16x32xf32>
    %cst_91 = arith.constant dense<0.000000e+00> : vector<16x8xf32>
    %274 = tpu.matmul %273, %272, %cst_91 {dimension_numbers = #tpu.dot_dimension_numbers<[1], [0], [0], [1], [0, 0, 1, 1], [], []>} : vector<16x32xf32>, vector<32x8xf32>, vector<16x8xf32> -> vector<16x8xf32>
    %c0_92 = arith.constant 0 : index
    %c0_93 = arith.constant 0 : index
    %275 = vector.load %arg9[%c0_92, %c0_93] : memref<16x1xf32, #tpu.memory_space<vmem>>, vector<16x1xf32>
    %276 = vector.broadcast %275 : vector<16x1xf32> to vector<16x8xf32>
    %277 = arith.addf %274, %276 : vector<16x8xf32>
    %c1 = arith.constant 1 : index
    %c0_94 = arith.constant 0 : index
    %c0_95 = arith.constant 0 : index
    %278 = vector.load %arg14[%c1, %c0_94, %c0_95] : memref<2x16x16xf32, #tpu.memory_space<vmem>>, vector<1x16x16xf32>
    %279 = vector.shape_cast %278 : vector<1x16x16xf32> to vector<16x16xf32>
    %cst_96 = arith.constant dense<0.000000e+00> : vector<16x8xf32>
    %280 = tpu.matmul %279, %277, %cst_96 {dimension_numbers = #tpu.dot_dimension_numbers<[1], [0], [0], [1], [0, 0, 1, 1], [], []>} : vector<16x16xf32>, vector<16x8xf32>, vector<16x8xf32> -> vector<16x8xf32>
    %c0_97 = arith.constant 0 : index
    %c0_98 = arith.constant 0 : index
    %281 = vector.load %arg10[%c0_97, %c0_98] : memref<32x16xf32, #tpu.memory_space<vmem>>, vector<32x16xf32>
    %cst_99 = arith.constant dense<0.000000e+00> : vector<32x8xf32>
    %282 = tpu.matmul %281, %280, %cst_99 {dimension_numbers = #tpu.dot_dimension_numbers<[1], [0], [0], [1], [0, 0, 1, 1], [], []>} : vector<32x16xf32>, vector<16x8xf32>, vector<32x8xf32> -> vector<32x8xf32>
    %c0_100 = arith.constant 0 : index
    %c0_101 = arith.constant 0 : index
    %283 = vector.load %arg11[%c0_100, %c0_101] : memref<32x1xf32, #tpu.memory_space<vmem>>, vector<32x1xf32>
    %284 = vector.broadcast %283 : vector<32x1xf32> to vector<32x8xf32>
    %285 = arith.addf %282, %284 : vector<32x8xf32>
    %cst_102 = arith.constant 0.000000e+00 : f32
    %286 = vector.broadcast %cst_102 : f32 to vector<32x8xf32>
    %287 = arith.maximumf %285, %286 : vector<32x8xf32>
    %c0_103 = arith.constant 0 : index
    %c0_104 = arith.constant 0 : index
    %288 = vector.load %arg12[%c0_103, %c0_104] : memref<8x32xf32, #tpu.memory_space<vmem>>, vector<8x32xf32>
    %cst_105 = arith.constant dense<0.000000e+00> : vector<8x8xf32>
    %289 = tpu.matmul %288, %287, %cst_105 {dimension_numbers = #tpu.dot_dimension_numbers<[1], [0], [0], [1], [0, 0, 1, 1], [], []>} : vector<8x32xf32>, vector<32x8xf32>, vector<8x8xf32> -> vector<8x8xf32>
    %c0_106 = arith.constant 0 : index
    %c0_107 = arith.constant 0 : index
    %290 = vector.load %arg13[%c0_106, %c0_107] : memref<8x1xf32, #tpu.memory_space<vmem>>, vector<8x1xf32>
    %291 = vector.broadcast %290 : vector<8x1xf32> to vector<8x8xf32>
    %292 = arith.addf %289, %291 : vector<8x8xf32>
    %c0_108 = arith.constant 0 : index
    %c0_109 = arith.constant 0 : index
    %293 = vector.load %arg1[%c0_108, %c0_109] : memref<16x16xf32, #tpu.memory_space<vmem>>, vector<16x16xf32>
    %cst_110 = arith.constant dense<0.000000e+00> : vector<16x8xf32>
    %294 = tpu.matmul %293, %263, %cst_110 {dimension_numbers = #tpu.dot_dimension_numbers<[1], [0], [0], [1], [0, 0, 1, 1], [], []>} : vector<16x16xf32>, vector<16x8xf32>, vector<16x8xf32> -> vector<16x8xf32>
    %295 = vector.extract_strided_slice %294 {offsets = [0, 0], sizes = [4, 4], strides = [1, 1]} : vector<16x8xf32> to vector<4x4xf32>
    %296 = vector.extract_strided_slice %294 {offsets = [4, 0], sizes = [4, 4], strides = [1, 1]} : vector<16x8xf32> to vector<4x4xf32>
    %297 = vector.extract_strided_slice %294 {offsets = [8, 0], sizes = [4, 4], strides = [1, 1]} : vector<16x8xf32> to vector<4x4xf32>
    %298 = vector.extract_strided_slice %294 {offsets = [12, 0], sizes = [4, 4], strides = [1, 1]} : vector<16x8xf32> to vector<4x4xf32>
    %299 = tpu.concatenate %295, %296, %297, %298 in 1 : vector<4x4xf32>, vector<4x4xf32>, vector<4x4xf32>, vector<4x4xf32> -> vector<4x16xf32>
    %300 = vector.extract_strided_slice %294 {offsets = [0, 4], sizes = [4, 4], strides = [1, 1]} : vector<16x8xf32> to vector<4x4xf32>
    %301 = vector.extract_strided_slice %294 {offsets = [4, 4], sizes = [4, 4], strides = [1, 1]} : vector<16x8xf32> to vector<4x4xf32>
    %302 = vector.extract_strided_slice %294 {offsets = [8, 4], sizes = [4, 4], strides = [1, 1]} : vector<16x8xf32> to vector<4x4xf32>
    %303 = vector.extract_strided_slice %294 {offsets = [12, 4], sizes = [4, 4], strides = [1, 1]} : vector<16x8xf32> to vector<4x4xf32>
    %304 = tpu.concatenate %300, %301, %302, %303 in 1 : vector<4x4xf32>, vector<4x4xf32>, vector<4x4xf32>, vector<4x4xf32> -> vector<4x16xf32>
    %305 = tpu.concatenate %299, %304 in 0 : vector<4x16xf32>, vector<4x16xf32> -> vector<8x16xf32>
    %c0_111 = arith.constant 0 : index
    %c0_112 = arith.constant 0 : index
    %306 = vector.load %arg15[%c0_111, %c0_112] : memref<16x32xf32, #tpu.memory_space<vmem>>, vector<16x32xf32>
    %cst_113 = arith.constant dense<0.000000e+00> : vector<8x32xf32>
    %307 = tpu.matmul %305, %306, %cst_113 {dimension_numbers = #tpu.dot_dimension_numbers<[1], [0], [0], [1], [0, 0, 1, 1], [], []>} : vector<8x16xf32>, vector<16x32xf32>, vector<8x32xf32> -> vector<8x32xf32>
    %c0_114 = arith.constant 0 : index
    %c0_115 = arith.constant 0 : index
    %308 = vector.load %arg16[%c0_114, %c0_115] : memref<1x32xf32, #tpu.memory_space<vmem>>, vector<1x32xf32>
    %309 = vector.broadcast %308 : vector<1x32xf32> to vector<8x32xf32>
    %310 = arith.addf %307, %309 : vector<8x32xf32>
    %311 = math.tanh %310 : vector<8x32xf32>
    %c0_116 = arith.constant 0 : index
    %c0_117 = arith.constant 0 : index
    %312 = vector.load %arg17[%c0_116, %c0_117] : memref<32x16xf32, #tpu.memory_space<vmem>>, vector<32x16xf32>
    %cst_118 = arith.constant dense<0.000000e+00> : vector<8x16xf32>
    %313 = tpu.matmul %311, %312, %cst_118 {dimension_numbers = #tpu.dot_dimension_numbers<[1], [0], [0], [1], [0, 0, 1, 1], [], []>} : vector<8x32xf32>, vector<32x16xf32>, vector<8x16xf32> -> vector<8x16xf32>
    %c0_119 = arith.constant 0 : index
    %c0_120 = arith.constant 0 : index
    %314 = vector.load %arg18[%c0_119, %c0_120] : memref<1x16xf32, #tpu.memory_space<vmem>>, vector<1x16xf32>
    %315 = vector.broadcast %314 : vector<1x16xf32> to vector<8x16xf32>
    %316 = arith.addf %313, %315 : vector<8x16xf32>
    %c0_121 = arith.constant 0 : index
    %c0_122 = arith.constant 0 : index
    %317 = vector.load %arg4[%c0_121, %c0_122] : memref<8x8xf32, #tpu.memory_space<vmem>>, vector<8x8xf32>
    %cst_123 = arith.constant dense<0.000000e+00> : vector<8x16xf32>
    %318 = tpu.matmul %317, %316, %cst_123 {dimension_numbers = #tpu.dot_dimension_numbers<[1], [0], [0], [1], [0, 0, 1, 1], [], []>} : vector<8x8xf32>, vector<8x16xf32>, vector<8x16xf32> -> vector<8x16xf32>
    %319 = vector.extract_strided_slice %318 {offsets = [0, 0], sizes = [2, 16], strides = [1, 1]} : vector<8x16xf32> to vector<2x16xf32>
    %320 = vector.extract_strided_slice %318 {offsets = [2, 0], sizes = [2, 16], strides = [1, 1]} : vector<8x16xf32> to vector<2x16xf32>
    %321 = vector.extract_strided_slice %318 {offsets = [4, 0], sizes = [2, 16], strides = [1, 1]} : vector<8x16xf32> to vector<2x16xf32>
    %322 = vector.extract_strided_slice %318 {offsets = [6, 0], sizes = [2, 16], strides = [1, 1]} : vector<8x16xf32> to vector<2x16xf32>
    %323 = arith.mulf %319, %319 : vector<2x16xf32>
    %cst_124 = arith.constant dense<0.000000e+00> : vector<2xf32>
    %324 = vector.multi_reduction <add>, %323, %cst_124 [1] : vector<2x16xf32> to vector<2xf32>
    %325 = vector.shape_cast %324 : vector<2xf32> to vector<2x1xf32>
    %326 = arith.mulf %319, %320 : vector<2x16xf32>
    %cst_125 = arith.constant dense<0.000000e+00> : vector<2xf32>
    %327 = vector.multi_reduction <add>, %326, %cst_125 [1] : vector<2x16xf32> to vector<2xf32>
    %328 = vector.shape_cast %327 : vector<2xf32> to vector<2x1xf32>
    %329 = arith.mulf %319, %321 : vector<2x16xf32>
    %cst_126 = arith.constant dense<0.000000e+00> : vector<2xf32>
    %330 = vector.multi_reduction <add>, %329, %cst_126 [1] : vector<2x16xf32> to vector<2xf32>
    %331 = vector.shape_cast %330 : vector<2xf32> to vector<2x1xf32>
    %332 = arith.mulf %320, %320 : vector<2x16xf32>
    %cst_127 = arith.constant dense<0.000000e+00> : vector<2xf32>
    %333 = vector.multi_reduction <add>, %332, %cst_127 [1] : vector<2x16xf32> to vector<2xf32>
    %334 = vector.shape_cast %333 : vector<2xf32> to vector<2x1xf32>
    %335 = arith.mulf %320, %321 : vector<2x16xf32>
    %cst_128 = arith.constant dense<0.000000e+00> : vector<2xf32>
    %336 = vector.multi_reduction <add>, %335, %cst_128 [1] : vector<2x16xf32> to vector<2xf32>
    %337 = vector.shape_cast %336 : vector<2xf32> to vector<2x1xf32>
    %338 = arith.mulf %321, %321 : vector<2x16xf32>
    %cst_129 = arith.constant dense<0.000000e+00> : vector<2xf32>
    %339 = vector.multi_reduction <add>, %338, %cst_129 [1] : vector<2x16xf32> to vector<2xf32>
    %340 = vector.shape_cast %339 : vector<2xf32> to vector<2x1xf32>
    %341 = arith.addf %325, %334 : vector<2x1xf32>
    %342 = arith.addf %341, %340 : vector<2x1xf32>
    %cst_130 = arith.constant 9.99999974E-5 : f32
    %343 = vector.broadcast %cst_130 : f32 to vector<2x1xf32>
    %344 = arith.mulf %343, %342 : vector<2x1xf32>
    %cst_131 = arith.constant 0.333333343 : f32
    %345 = vector.broadcast %cst_131 : f32 to vector<2x1xf32>
    %346 = arith.mulf %344, %345 : vector<2x1xf32>
    %cst_132 = arith.constant 9.99999997E-7 : f32
    %347 = vector.broadcast %cst_132 : f32 to vector<2x1xf32>
    %348 = arith.addf %346, %347 : vector<2x1xf32>
    %349 = arith.addf %325, %348 : vector<2x1xf32>
    %350 = arith.addf %334, %348 : vector<2x1xf32>
    %351 = arith.addf %340, %348 : vector<2x1xf32>
    %352 = arith.mulf %350, %351 : vector<2x1xf32>
    %353 = arith.mulf %337, %337 : vector<2x1xf32>
    %354 = arith.subf %352, %353 : vector<2x1xf32>
    %355 = arith.mulf %331, %337 : vector<2x1xf32>
    %356 = arith.mulf %328, %351 : vector<2x1xf32>
    %357 = arith.subf %355, %356 : vector<2x1xf32>
    %358 = arith.mulf %328, %337 : vector<2x1xf32>
    %359 = arith.mulf %331, %350 : vector<2x1xf32>
    %360 = arith.subf %358, %359 : vector<2x1xf32>
    %361 = arith.mulf %349, %351 : vector<2x1xf32>
    %362 = arith.mulf %331, %331 : vector<2x1xf32>
    %363 = arith.subf %361, %362 : vector<2x1xf32>
    %364 = arith.mulf %328, %331 : vector<2x1xf32>
    %365 = arith.mulf %349, %337 : vector<2x1xf32>
    %366 = arith.subf %364, %365 : vector<2x1xf32>
    %367 = arith.mulf %349, %350 : vector<2x1xf32>
    %368 = arith.mulf %328, %328 : vector<2x1xf32>
    %369 = arith.subf %367, %368 : vector<2x1xf32>
    %370 = arith.mulf %349, %354 : vector<2x1xf32>
    %371 = arith.mulf %328, %357 : vector<2x1xf32>
    %372 = arith.addf %370, %371 : vector<2x1xf32>
    %373 = arith.mulf %331, %360 : vector<2x1xf32>
    %374 = arith.addf %372, %373 : vector<2x1xf32>
    %cst_133 = arith.constant 1.000000e+00 : f32
    %375 = vector.broadcast %cst_133 : f32 to vector<2x1xf32>
    %376 = arith.divf %375, %374 : vector<2x1xf32>
    %377 = vector.broadcast %354 : vector<2x1xf32> to vector<2x16xf32>
    %378 = arith.mulf %377, %320 : vector<2x16xf32>
    %379 = vector.broadcast %357 : vector<2x1xf32> to vector<2x16xf32>
    %380 = arith.mulf %379, %321 : vector<2x16xf32>
    %381 = arith.addf %378, %380 : vector<2x16xf32>
    %382 = vector.broadcast %360 : vector<2x1xf32> to vector<2x16xf32>
    %383 = arith.mulf %382, %322 : vector<2x16xf32>
    %384 = arith.addf %381, %383 : vector<2x16xf32>
    %385 = vector.broadcast %376 : vector<2x1xf32> to vector<2x16xf32>
    %386 = arith.mulf %384, %385 : vector<2x16xf32>
    %387 = vector.broadcast %357 : vector<2x1xf32> to vector<2x16xf32>
    %388 = arith.mulf %387, %320 : vector<2x16xf32>
    %389 = vector.broadcast %363 : vector<2x1xf32> to vector<2x16xf32>
    %390 = arith.mulf %389, %321 : vector<2x16xf32>
    %391 = arith.addf %388, %390 : vector<2x16xf32>
    %392 = vector.broadcast %366 : vector<2x1xf32> to vector<2x16xf32>
    %393 = arith.mulf %392, %322 : vector<2x16xf32>
    %394 = arith.addf %391, %393 : vector<2x16xf32>
    %395 = vector.broadcast %376 : vector<2x1xf32> to vector<2x16xf32>
    %396 = arith.mulf %394, %395 : vector<2x16xf32>
    %397 = vector.broadcast %360 : vector<2x1xf32> to vector<2x16xf32>
    %398 = arith.mulf %397, %320 : vector<2x16xf32>
    %399 = vector.broadcast %366 : vector<2x1xf32> to vector<2x16xf32>
    %400 = arith.mulf %399, %321 : vector<2x16xf32>
    %401 = arith.addf %398, %400 : vector<2x16xf32>
    %402 = vector.broadcast %369 : vector<2x1xf32> to vector<2x16xf32>
    %403 = arith.mulf %402, %322 : vector<2x16xf32>
    %404 = arith.addf %401, %403 : vector<2x16xf32>
    %405 = vector.broadcast %376 : vector<2x1xf32> to vector<2x16xf32>
    %406 = arith.mulf %404, %405 : vector<2x16xf32>
    %407 = vector.broadcast %325 : vector<2x1xf32> to vector<2x16xf32>
    %408 = arith.mulf %407, %386 : vector<2x16xf32>
    %409 = vector.broadcast %328 : vector<2x1xf32> to vector<2x16xf32>
    %410 = arith.mulf %409, %396 : vector<2x16xf32>
    %411 = arith.addf %408, %410 : vector<2x16xf32>
    %412 = vector.broadcast %331 : vector<2x1xf32> to vector<2x16xf32>
    %413 = arith.mulf %412, %406 : vector<2x16xf32>
    %414 = arith.addf %411, %413 : vector<2x16xf32>
    %415 = vector.broadcast %328 : vector<2x1xf32> to vector<2x16xf32>
    %416 = arith.mulf %415, %386 : vector<2x16xf32>
    %417 = vector.broadcast %334 : vector<2x1xf32> to vector<2x16xf32>
    %418 = arith.mulf %417, %396 : vector<2x16xf32>
    %419 = arith.addf %416, %418 : vector<2x16xf32>
    %420 = vector.broadcast %337 : vector<2x1xf32> to vector<2x16xf32>
    %421 = arith.mulf %420, %406 : vector<2x16xf32>
    %422 = arith.addf %419, %421 : vector<2x16xf32>
    %423 = vector.broadcast %331 : vector<2x1xf32> to vector<2x16xf32>
    %424 = arith.mulf %423, %386 : vector<2x16xf32>
    %425 = vector.broadcast %337 : vector<2x1xf32> to vector<2x16xf32>
    %426 = arith.mulf %425, %396 : vector<2x16xf32>
    %427 = arith.addf %424, %426 : vector<2x16xf32>
    %428 = vector.broadcast %340 : vector<2x1xf32> to vector<2x16xf32>
    %429 = arith.mulf %428, %406 : vector<2x16xf32>
    %430 = arith.addf %427, %429 : vector<2x16xf32>
    %431 = arith.mulf %322, %319 : vector<2x16xf32>
    %cst_134 = arith.constant dense<0.000000e+00> : vector<2xf32>
    %432 = vector.multi_reduction <add>, %431, %cst_134 [1] : vector<2x16xf32> to vector<2xf32>
    %433 = vector.shape_cast %432 : vector<2xf32> to vector<2x1xf32>
    %434 = arith.mulf %322, %320 : vector<2x16xf32>
    %cst_135 = arith.constant dense<0.000000e+00> : vector<2xf32>
    %435 = vector.multi_reduction <add>, %434, %cst_135 [1] : vector<2x16xf32> to vector<2xf32>
    %436 = vector.shape_cast %435 : vector<2xf32> to vector<2x1xf32>
    %437 = arith.mulf %322, %321 : vector<2x16xf32>
    %cst_136 = arith.constant dense<0.000000e+00> : vector<2xf32>
    %438 = vector.multi_reduction <add>, %437, %cst_136 [1] : vector<2x16xf32> to vector<2xf32>
    %439 = vector.shape_cast %438 : vector<2xf32> to vector<2x1xf32>
    %440 = vector.broadcast %433 : vector<2x1xf32> to vector<2x16xf32>
    %441 = arith.mulf %440, %386 : vector<2x16xf32>
    %442 = vector.broadcast %436 : vector<2x1xf32> to vector<2x16xf32>
    %443 = arith.mulf %442, %396 : vector<2x16xf32>
    %444 = arith.addf %441, %443 : vector<2x16xf32>
    %445 = vector.broadcast %439 : vector<2x1xf32> to vector<2x16xf32>
    %446 = arith.mulf %445, %406 : vector<2x16xf32>
    %447 = arith.addf %444, %446 : vector<2x16xf32>
    %448 = arith.mulf %447, %319 : vector<2x16xf32>
    %cst_137 = arith.constant dense<0.000000e+00> : vector<2xf32>
    %449 = vector.multi_reduction <add>, %448, %cst_137 [1] : vector<2x16xf32> to vector<2xf32>
    %450 = vector.shape_cast %449 : vector<2xf32> to vector<2x1xf32>
    %451 = arith.mulf %447, %320 : vector<2x16xf32>
    %cst_138 = arith.constant dense<0.000000e+00> : vector<2xf32>
    %452 = vector.multi_reduction <add>, %451, %cst_138 [1] : vector<2x16xf32> to vector<2xf32>
    %453 = vector.shape_cast %452 : vector<2xf32> to vector<2x1xf32>
    %454 = arith.mulf %447, %321 : vector<2x16xf32>
    %cst_139 = arith.constant dense<0.000000e+00> : vector<2xf32>
    %455 = vector.multi_reduction <add>, %454, %cst_139 [1] : vector<2x16xf32> to vector<2xf32>
    %456 = vector.shape_cast %455 : vector<2xf32> to vector<2x1xf32>
    %457 = vector.broadcast %450 : vector<2x1xf32> to vector<2x16xf32>
    %458 = arith.mulf %457, %386 : vector<2x16xf32>
    %459 = vector.broadcast %453 : vector<2x1xf32> to vector<2x16xf32>
    %460 = arith.mulf %459, %396 : vector<2x16xf32>
    %461 = arith.addf %458, %460 : vector<2x16xf32>
    %462 = vector.broadcast %456 : vector<2x1xf32> to vector<2x16xf32>
    %463 = arith.mulf %462, %406 : vector<2x16xf32>
    %464 = arith.addf %461, %463 : vector<2x16xf32>
    %465 = tpu.concatenate %319, %414, %422, %430, %447, %464 in 0 : vector<2x16xf32>, vector<2x16xf32>, vector<2x16xf32>, vector<2x16xf32>, vector<2x16xf32>, vector<2x16xf32> -> vector<12x16xf32>
    %c0_140 = arith.constant 0 : index
    %c0_141 = arith.constant 0 : index
    %466 = vector.load %arg5[%c0_140, %c0_141] : memref<12x12xf32, #tpu.memory_space<vmem>>, vector<12x12xf32>
    %cst_142 = arith.constant dense<0.000000e+00> : vector<12x16xf32>
    %467 = tpu.matmul %466, %465, %cst_142 {dimension_numbers = #tpu.dot_dimension_numbers<[1], [0], [0], [1], [0, 0, 1, 1], [], []>} : vector<12x12xf32>, vector<12x16xf32>, vector<12x16xf32> -> vector<12x16xf32>
    %c0_143 = arith.constant 0 : index
    %c0_144 = arith.constant 0 : index
    %468 = vector.load %arg19[%c0_143, %c0_144] : memref<16x32xf32, #tpu.memory_space<vmem>>, vector<16x32xf32>
    %cst_145 = arith.constant dense<0.000000e+00> : vector<12x32xf32>
    %469 = tpu.matmul %467, %468, %cst_145 {dimension_numbers = #tpu.dot_dimension_numbers<[1], [0], [0], [1], [0, 0, 1, 1], [], []>} : vector<12x16xf32>, vector<16x32xf32>, vector<12x32xf32> -> vector<12x32xf32>
    %c0_146 = arith.constant 0 : index
    %c0_147 = arith.constant 0 : index
    %470 = vector.load %arg20[%c0_146, %c0_147] : memref<1x32xf32, #tpu.memory_space<vmem>>, vector<1x32xf32>
    %471 = vector.broadcast %470 : vector<1x32xf32> to vector<12x32xf32>
    %472 = arith.addf %469, %471 : vector<12x32xf32>
    %473 = math.tanh %472 : vector<12x32xf32>
    %c0_148 = arith.constant 0 : index
    %c0_149 = arith.constant 0 : index
    %474 = vector.load %arg21[%c0_148, %c0_149] : memref<32x16xf32, #tpu.memory_space<vmem>>, vector<32x16xf32>
    %cst_150 = arith.constant dense<0.000000e+00> : vector<12x16xf32>
    %475 = tpu.matmul %473, %474, %cst_150 {dimension_numbers = #tpu.dot_dimension_numbers<[1], [0], [0], [1], [0, 0, 1, 1], [], []>} : vector<12x32xf32>, vector<32x16xf32>, vector<12x16xf32> -> vector<12x16xf32>
    %c0_151 = arith.constant 0 : index
    %c0_152 = arith.constant 0 : index
    %476 = vector.load %arg22[%c0_151, %c0_152] : memref<1x16xf32, #tpu.memory_space<vmem>>, vector<1x16xf32>
    %477 = vector.broadcast %476 : vector<1x16xf32> to vector<12x16xf32>
    %478 = arith.addf %475, %477 : vector<12x16xf32>
    %479 = vector.extract_strided_slice %478 {offsets = [8, 0], sizes = [4, 16], strides = [1, 1]} : vector<12x16xf32> to vector<4x16xf32>
    %480 = vector.extract_strided_slice %479 {offsets = [0, 0], sizes = [2, 4], strides = [1, 1]} : vector<4x16xf32> to vector<2x4xf32>
    %481 = vector.extract_strided_slice %479 {offsets = [2, 0], sizes = [2, 4], strides = [1, 1]} : vector<4x16xf32> to vector<2x4xf32>
    %482 = tpu.concatenate %480, %481 in 1 : vector<2x4xf32>, vector<2x4xf32> -> vector<2x8xf32>
    %483 = vector.extract_strided_slice %479 {offsets = [0, 4], sizes = [2, 4], strides = [1, 1]} : vector<4x16xf32> to vector<2x4xf32>
    %484 = vector.extract_strided_slice %479 {offsets = [2, 4], sizes = [2, 4], strides = [1, 1]} : vector<4x16xf32> to vector<2x4xf32>
    %485 = tpu.concatenate %483, %484 in 1 : vector<2x4xf32>, vector<2x4xf32> -> vector<2x8xf32>
    %486 = vector.extract_strided_slice %479 {offsets = [0, 8], sizes = [2, 4], strides = [1, 1]} : vector<4x16xf32> to vector<2x4xf32>
    %487 = vector.extract_strided_slice %479 {offsets = [2, 8], sizes = [2, 4], strides = [1, 1]} : vector<4x16xf32> to vector<2x4xf32>
    %488 = tpu.concatenate %486, %487 in 1 : vector<2x4xf32>, vector<2x4xf32> -> vector<2x8xf32>
    %489 = vector.extract_strided_slice %479 {offsets = [0, 12], sizes = [2, 4], strides = [1, 1]} : vector<4x16xf32> to vector<2x4xf32>
    %490 = vector.extract_strided_slice %479 {offsets = [2, 12], sizes = [2, 4], strides = [1, 1]} : vector<4x16xf32> to vector<2x4xf32>
    %491 = tpu.concatenate %489, %490 in 1 : vector<2x4xf32>, vector<2x4xf32> -> vector<2x8xf32>
    %492 = tpu.concatenate %482, %485, %488, %491 in 0 : vector<2x8xf32>, vector<2x8xf32>, vector<2x8xf32>, vector<2x8xf32> -> vector<8x8xf32>
    %c0_153 = arith.constant 0 : index
    %c0_154 = arith.constant 0 : index
    %493 = vector.load %arg3[%c0_153, %c0_154] : memref<8x8xf32, #tpu.memory_space<vmem>>, vector<8x8xf32>
    %cst_155 = arith.constant dense<0.000000e+00> : vector<8x8xf32>
    %494 = tpu.matmul %493, %492, %cst_155 {dimension_numbers = #tpu.dot_dimension_numbers<[1], [0], [0], [1], [0, 0, 1, 1], [], []>} : vector<8x8xf32>, vector<8x8xf32>, vector<8x8xf32> -> vector<8x8xf32>
    %495 = arith.addf %265, %292 : vector<8x8xf32>
    %496 = arith.addf %495, %494 : vector<8x8xf32>
    %497 = vector.broadcast %14 : vector<1x8xf32> to vector<8x8xf32>
    %498 = arith.mulf %496, %497 : vector<8x8xf32>
    %499 = vector.broadcast %4 : vector<1x8xf32> to vector<8x8xf32>
    %500 = arith.addf %498, %499 : vector<8x8xf32>
    %c0_156 = arith.constant 0 : index
    %c0_157 = arith.constant 0 : index
    %501 = vector.load %arg23[%c0_156, %c0_157] : memref<8x8xf32, #tpu.memory_space<vmem>>, vector<8x8xf32>
    tpu.vector_store %arg23[%c0_156, %c0_157], %500 {strides = array<i32>} : memref<8x8xf32, #tpu.memory_space<vmem>>, vector<8x8xf32>,
    return
  }
}

</mosaic_0001>

<bundles_post_ra>
// kernel: net_forward.1
= control target key start
LH: loop header
LB: loop body
LE: loop exit
PB: predicated region body
PF: predicated region fallthrough
CT: control target
= control target key end

     0   :  { %vm76_vm0 = vcmask 64512   ;;  %vm141_vm1 = vcmask 130048   ;;  %v3503_v3 = vmov 0   ;;  %vm257_vm4 = vcmask 261120   ;;  %s3508_s25 = smov 8   ;;  %s4362_s0 = inlined_call_operand.vmem [shape: f32[16,8], index: 0, kind: input, shape index: {}]   ;;  %s4363_s6 = inlined_call_operand.vmem [shape: f32[32,16], index: 6, kind: input, shape index: {}]   ;;  %s4364_s7 = inlined_call_operand.vmem [shape: f32[32,1], index: 7, kind: input, shape index: {}]   ;;  %s4365_s9 = inlined_call_operand.vmem [shape: f32[16,1], index: 9, kind: input, shape index: {}]   ;;  %s4366_s11 = inlined_call_operand.vmem [shape: f32[32,1], index: 11, kind: input, shape index: {}]   ;;  %s4367_s8 = inlined_call_operand.vmem [shape: f32[16,32], index: 8, kind: input, shape index: {}]   ;;  %s4368_s14 = inlined_call_operand.vmem [shape: f32[2,16,16], index: 14, kind: input, shape index: {}]   ;;  %s4369_s10 = inlined_call_operand.vmem [shape: f32[32,16], index: 10, kind: input, shape index: {}]   ;;  %s4370_s1 = inlined_call_operand.vmem [shape: f32[16,16], index: 1, kind: input, shape index: {}]   ;;  %s4371_s12 = inlined_call_operand.vmem [shape: f32[8,32], index: 12, kind: input, shape index: {}]   ;;  %s4372_s15 = inlined_call_operand.vmem [shape: f32[16,32], index: 15, kind: input, shape index: {}]   ;;  %s4373_s17 = inlined_call_operand.vmem [shape: f32[32,16], index: 17, kind: input, shape index: {}]   ;;  %s4374_s16 = inlined_call_operand.vmem [shape: f32[1,32], index: 16, kind: input, shape index: {}]   ;;  %s4375_s18 = inlined_call_operand.vmem [shape: f32[1,16], index: 18, kind: input, shape index: {}]   ;;  %s4376_s4 = inlined_call_operand.vmem [shape: f32[8,8], index: 4, kind: input, shape index: {}]   ;;  %s4377_s5 = inlined_call_operand.vmem [shape: f32[12,12], index: 5, kind: input, shape index: {}]   ;;  %s4378_s19 = inlined_call_operand.vmem [shape: f32[16,32], index: 19, kind: input, shape index: {}]   ;;  %s4379_s21 = inlined_call_operand.vmem [shape: f32[32,16], index: 21, kind: input, shape index: {}]   ;;  %s4380_s20 = inlined_call_operand.vmem [shape: f32[1,32], index: 20, kind: input, shape index: {}]   ;;  %s4381_s22 = inlined_call_operand.vmem [shape: f32[1,16], index: 22, kind: input, shape index: {}]   ;;  %s4382_s2 = inlined_call_operand.vmem [shape: f32[16,16], index: 2, kind: input, shape index: {}]   ;;  %s4383_s3 = inlined_call_operand.vmem [shape: f32[8,8], index: 3, kind: input, shape index: {}]   ;;  %s4384_s13 = inlined_call_operand.vmem [shape: f32[8,1], index: 13, kind: input, shape index: {}]   ;;  %s4385_s23 = inlined_call_operand.vmem [shape: f32[8,8], index: 23, kind: output, shape index: {}]  }
   0x1   :  { %4406 = sst [smem:[#allocation13_spill]] %s4362_s0  ;;  %3481 = vset.pattern.permute.xlu0 %v3503_v3  ;;  %3482 = vset.pattern.permute.xlu1 %v3503_v3  ;;  %vm3505_vm5 = vmmov 0   ;;  %vm727_vm6 = vcmask 31744   ;;  %vm730_vm7 = vcmask 97280   ;;  %vm748_vm8 = vcmask 1043456  }
   0x2   :  { %4407 = sst [smem:[#allocation14_spill]] %s4363_s6  ;;  %vm1009_vm9 = vcmask 125954   ;;  %vm992_vm10 = vcmask 123904   ;;  %vm1016_vm11 = vcmask 128004   ;;  %vm1178_vm12 = vcmask 130054  }
   0x3   :  { %4408 = sst [smem:[#allocation15_spill]] %s4364_s7  ;;  %vm1232_vm13 = vcmask 1041408   ;;  %vm1235_vm14 = vcmask 1045504  }
   0x4   :  { %4409 = sst [smem:[#allocation16_spill]] %s4365_s9 }
   0x5   :  { %4410 = sst [smem:[#allocation17_spill]] %s4366_s11 }
   0x6   :  { %4411 = sst [smem:[#allocation18_spill]] %s4367_s8 }
   0x7   :  { %4412 = sst [smem:[#allocation19_spill]] %s4368_s14 }
   0x8   :  { %4413 = sst [smem:[#allocation20_spill]] %s4369_s10 }
   0x9   :  { %s4414_s24 = sld [smem:[#allocation13_spill]] }
   0xa   :  { %s4415_s7 = sld [smem:[#allocation14_spill]] }
   0xb   :  { %s4416_s10 = sld [smem:[#allocation15_spill]] }
   0xc   :  { %s4417_s8 = sld [smem:[#allocation16_spill]] }
   0xd   :  { %s4418_s28 = sld [smem:[#allocation17_spill]] }
   0xe   :  { %s4422_s11 = sld [smem:[#allocation19_spill]] }
   0xf   :  { %v74_v0 = vld [vmem:[%s4414_s24] sm:$0xff]  ;;  %v75_v1 = vld [vmem:[%s4414_s24 + $0x8] sm:$0xff]  ;;  %s4423_s6 = sld [smem:[#allocation20_spill]]  ;;  %s3507_s24 = smov 124  }
  0x10   :  { %v3641_v2 = vld [vmem:[%s4415_s7] sm:$0xff]  ;;  %v77_v4 = vsel %vm76_vm0, %v74_v0, 0.0  ;;  %v78_v5 = vsel %vm76_vm0, %v75_v1, 0.0  ;;  %v3695_v47 = vld [vmem:[%s4415_s7 + $0x8] sm:$0xff]  ;;  %v3701_v48 = vld [vmem:[%s4415_s7 + $0x10] sm:$0xff] }
  0x11   :  { %3251 = vmatprep.mubr.msk.f32.mxu0 %vm141_vm1, %v3641_v2  ;;  %v79_v6 = vadd.f32 %v78_v5, %v77_v4  ;;  %v120_v7 = vld [vmem:[%s4416_s10 + $0x18] sm:$0xff]  ;;  %v118_v8 = vld [vmem:[%s4416_s10 + $0x8] sm:$0xff]  ;;  %v119_v10 = vld [vmem:[%s4416_s10 + $0x10] sm:$0xff] }
  0x12   :  { %138 = vperm.xlu0 %3481, %v120_v7   ;;  %128 = vperm.xlu1 %3482, %v118_v8   ;;  %v117_v11 = vld [vmem:[%s4416_s10] sm:$0xff]  ;;  %v246_v14 = vld [vmem:[%s4417_s8 + $0x8] sm:$0xff]  ;;  %v3711_v49 = vld [vmem:[%s4415_s7 + $0x18] sm:$0xff]  ;;  %s4421_s10 = sld [smem:[#allocation18_spill]] }
  0x13   :  { %v80_v9 = vrot.slane %v79_v6, 4  ;;  %v245_v15 = vld [vmem:[%s4417_s8] sm:$0xff]  ;;  %v429_v18 = vld [vmem:[%s4418_s28 + $0x18] sm:$0xff]  ;;  %v428_v19 = vld [vmem:[%s4418_s28 + $0x10] sm:$0xff] }
  0x14   :  { %v427_v22 = vld [vmem:[%s4418_s28 + $0x8] sm:$0xff]  ;;  %v426_v23 = vld [vmem:[%s4418_s28] sm:$0xff]  ;;  %s3510_s28 = smov 116  }
  0x15   :  { %v81_v12 = vadd.f32 %v80_v9, %v79_v6  ;;  %v339_v5 = vld [vmem:[%s4422_s11] sm:$0xff] }
  0x16   :  { %133 = vperm.xlu0 %3481, %v119_v10   ;;  %123 = vperm.xlu1 %3482, %v117_v11  }
  0x17   :  { %v82_v13 = vrot.slane %v81_v12, 2 }
  0x18   :  { %v3718_v50 = vld [vmem:[%s4421_s10] sm:$0xff]  ;;  %v3737_v4 = vld [vmem:[%s4421_s10 + $0x8] sm:$0xff] }
  0x19   :  { %v83_v16 = vadd.f32 %v82_v13, %v81_v12  ;;  %3265 = vmatprep.mubr.msk.f32.mxu1 %vm257_vm4, %v3718_v50  ;;  %v340_v12 = vld [vmem:[%s4422_s11 + $0x8] sm:$0xff]  ;;  %v3758_v13 = vld [vmem:[%s4423_s6] sm:$0xff] }
  0x1a   :  { %254 = vperm.xlu0 %3481, %v246_v14   ;;  %249 = vperm.xlu1 %3482, %v245_v15  }
  0x1b   :  { %v84_v17 = vrot.slane %v83_v16, 1 }
  0x1d   :  { %v85_v20 = vadd.f32 %v84_v17, %v83_v16  ;;  %v3765_v16 = vld [vmem:[%s4423_s6 + $0x8] sm:$0xff]  ;;  %v3770_v17 = vld [vmem:[%s4423_s6 + $0x10] sm:$0xff] }
  0x1e   :  { %447 = vperm.xlu0 %3481, %v429_v18   ;;  %442 = vperm.xlu1 %3482, %v428_v19   ;;  %v3780_v18 = vld [vmem:[%s4423_s6 + $0x18] sm:$0xff]  ;;  %v3787_v19 = vld [vmem:[%s4370_s1] sm:$0xff] }
  0x1f   :  { %v3671_v21 = vmul.f32 0.0625, %v85_v20  ;;  %v3795_v20 = vld [vmem:[%s4370_s1 + $0x8] sm:$0xff]  ;;  %s3506_s1 = smov 4  }
  0x21   :  { %4419 = vst [vmem:[#allocation2_spill] sm:$0xff] %v3671_v21  ;;  %v88_v24 = vsub.f32 %v74_v0, %v3671_v21  ;;  %v89_v25 = vsub.f32 %v75_v1, %v3671_v21 }
  0x22   :  { %437 = vperm.xlu0 %3481, %v427_v22   ;;  %432 = vperm.xlu1 %3482, %v426_v23   ;;  %v4394_v22 = vmov 0.0  }
  0x23   :  { %v90_v26 = vmul.f32 %v88_v24, %v88_v24  ;;  %v91_v27 = vmul.f32 %v89_v25, %v89_v25 }
  0x25   :  { %v92_v28 = vsel %vm76_vm0, %v90_v26, 0.0  ;;  %v93_v29 = vsel %vm76_vm0, %v91_v27, 0.0 }
  0x26   :  { %v94_v30 = vadd.f32 %v93_v29, %v92_v28 }
  0x28   :  { %v95_v31 = vrot.slane %v94_v30, 4 }
  0x2a   :  { %v96_v32 = vadd.f32 %v95_v31, %v94_v30 }
  0x2c   :  { %v97_v33 = vrot.slane %v96_v32, 2 }
  0x2e   :  { %v98_v34 = vadd.f32 %v97_v33, %v96_v32 }
  0x30   :  { %v99_v35 = vrot.slane %v98_v34, 1 }
  0x32   :  { %v100_v36 = vadd.f32 %v99_v35, %v98_v34 }
  0x34   :  { %v101_v37 = vmul.f32 0.0625, %v100_v36 }
  0x36   :  { %v102_v38 = vadd.f32 1e-05, %v101_v37 }
  0x38   :  { %3483 = vrsqrt.f32 %v102_v38  ;;  %vm105_vm2 = vcmp.eq.f32.partialorder %v102_v38, inf  ;;  %v108_v40 = vand.u32 2147483648, %v102_v38  ;;  %vm107_vm3 = vcmp.eq.f32.partialorder %v102_v38, 0.0 }
  0x45   :  { %v3484_v39 = vpop.eup %3483 }
  0x46   :  { %v104_v41 = vmul.f32 %v3484_v39, %v102_v38 }
  0x48   :  { %v106_v42 = vsel %vm105_vm2, %v102_v38, %v104_v41 }
  0x49   :  { %v3683_v43 = vsel %vm107_vm3, %v108_v40, %v106_v42 }
  0x4a   :  { %4420 = vst [vmem:[#allocation3_spill] sm:$0xff] %v3683_v43  ;;  %3485 = vrcp.f32 %v3683_v43 }
  0x57   :  { %v3486_v44 = vpop.eup %3485 }
  0x58   :  { %v3686_v45 = vmul.f32 %v3486_v44, %v89_v25  ;;  %v3688_v46 = vmul.f32 %v3486_v44, %v88_v24  ;;  %v3827_v44 = vld [vmem:[%s4371_s12] sm:$0xff]  ;;  %s3509_s12 = smov 12  }
  0x59   :  { %4426 = vst [vmem:[#allocation6_spill] sm:$0xff] %v3827_v44 }
  0x5a   :  { %3247 = vmatprep.subr.mxu0 %v3686_v45 }
  0x5b   :  { %3248 = vmatpush3.msra.mxu0 %v3686_v45 }
  0x5c   :  { %3249 = vmatprep.subr.mxu0 %v3688_v46 }
  0x5d   :  { %3250 = vmatpush3.msra.mxu0 %v3688_v46 }
  0x5e   :  { %3252 = vmatmul.mubr.msk.f32.vlgmr.msra.gmra.mxu0 %vm141_vm1, %v3695_v47 }
  0x5f   :  { %3254 = vmatprep.mubr.msk.f32.mxu0 %vm141_vm1, %v3701_v48 }
  0x62   :  { %3255 = vmatmul.mubr.msk.f32.gmra.mxu0 %vm141_vm1, %v3711_v49 }
  0x63   :  { %3272 = vmatprep.mubr.msk.f32.mxu0 %vm141_vm1, %v339_v5 }
  0x8d   :  { %v3722_v51 = vpop.permute.xlu0 %138  ;;  %v3724_v53 = vpop.permute.xlu1 %128 }
  0x91   :  { %v3727_v57 = vpop.permute.xlu0 %133  ;;  %v3731_v62 = vpop.permute.xlu1 %123 }
  0x95   :  { %v3745_v6 = vpop.permute.xlu0 %254  ;;  %v3748_v9 = vpop.permute.xlu1 %249 }
  0x99   :  { %v3803_v23 = vpop.permute.xlu0 %447  ;;  %v3805_v25 = vpop.permute.xlu1 %442 }
  0x9a   :  { %4424 = vst [vmem:[#allocation4_spill] sm:$0xff] %v3805_v25 }
  0x9d   :  { %v3812_v29 = vpop.permute.xlu0 %437  ;;  %v3816_v34 = vpop.permute.xlu1 %432 }
  0x9e   :  { %4425 = vst [vmem:[#allocation5_spill] sm:$0xff] %v3816_v34 }
 0x11e   :  { %v3253_v52 = vpop.f32.mrf.mxu0 }
 0x11f   :  { %v226_v59 = vadd.f32 %v3253_v52, %v3724_v53  ;;  %v3833_v52 = vld [vmem:[%s4372_s15 + $0x8] sm:$0xff] }
 0x120   :  { %v220_v54 = vpop.f32.mrf.mxu0  ;;  %4427 = vst [vmem:[#allocation7_spill] sm:$0xff] %v3833_v52 }
 0x121   :  { %v221_v63 = vadd.f32 %v220_v54, %v3731_v62  ;;  %v240_v1 = vmax.f32 %v226_v59, 0.0  ;;  %v3842_v54 = vld [vmem:[%s4372_s15] sm:$0xff] }
 0x122   :  { %v3256_v55 = vpop.f32.mrf.mxu0  ;;  %4428 = vst [vmem:[#allocation8_spill] sm:$0xff] %v3842_v54 }
 0x123   :  { %v236_v56 = vadd.f32 %v3256_v55, %v3722_v51  ;;  %v239_v3 = vmax.f32 %v221_v63, 0.0 }
 0x124   :  { %v230_v58 = vpop.f32.mrf.mxu0 }
 0x125   :  { %v242_v60 = vmax.f32 %v236_v56, 0.0  ;;  %v231_v61 = vadd.f32 %v230_v58, %v3727_v57 }
 0x127   :  { %v241_v0 = vmax.f32 %v231_v61, 0.0  ;;  %3257 = vmatprep.subr.mxu1 %v242_v60 }
 0x128   :  { %3258 = vmatpush3.msra.mxu1 %v242_v60 }
 0x129   :  { %3259 = vmatprep.subr.mxu1 %v241_v0 }
 0x12a   :  { %3260 = vmatpush3.msra.mxu1 %v241_v0 }
 0x12b   :  { %3261 = vmatprep.subr.mxu1 %v240_v1 }
 0x12c   :  { %3262 = vmatpush3.msra.mxu1 %v240_v1 }
 0x12d   :  { %3263 = vmatprep.subr.mxu1 %v239_v3 }
 0x12e   :  { %3264 = vmatpush3.msra.mxu1 %v239_v3 }
 0x12f   :  { %3266 = vmatmul.mubr.msk.f32.vlgmr.msra.gmra.mxu1 %vm257_vm4, %v3737_v4 }
 0x130   :  { %3279 = vmatprep.mubr.msk.f32.mxu1 %vm141_vm1, %v3758_v13 }
 0x1ef   :  { %v3267_v7 = vpop.f32.mrf.mxu1 }
 0x1f0   :  { %v336_v8 = vadd.f32 %v3267_v7, %v3745_v6 }
 0x1f1   :  { %v330_v10 = vpop.f32.mrf.mxu1 }
 0x1f2   :  { %v331_v11 = vadd.f32 %v330_v10, %v3748_v9  ;;  %3268 = vmatprep.subr.mxu0 %v336_v8 }
 0x1f3   :  { %3269 = vmatpush3.msra.mxu0 %v336_v8 }
 0x1f4   :  { %3270 = vmatprep.subr.mxu0 %v331_v11 }
 0x1f5   :  { %3271 = vmatpush3.msra.mxu0 %v331_v11  ;;  %v3865_v11 = vld [vmem:[%s4373_s17 + $0x18] sm:$0xff] }
 0x1f6   :  { %3273 = vmatmul.mubr.msk.f32.vlgmr.msra.gmra.mxu0 %vm141_vm1, %v340_v12  ;;  %3285 = vmatprep.subr.mxu0 %v4394_v22  ;;  %v3870_v12 = vld [vmem:[%s4373_s17 + $0x10] sm:$0xff] }
 0x1f7   :  { %3293 = vmatprep.mubr.msk.f32.mxu0 %vm3505_vm5, %v4394_v22 }
 0x2b6   :  { %v3274_v14 = vpop.f32.mrf.mxu0 }
 0x2b7   :  { %3275 = vmatprep.subr.mxu1 %v3274_v14 }
 0x2b8   :  { %v413_v15 = vpop.f32.mrf.mxu0  ;;  %3276 = vmatpush3.msra.mxu1 %v3274_v14  ;;  %v3877_v14 = vld [vmem:[%s4373_s17 + $0x8] sm:$0xff] }
 0x2b9   :  { %3277 = vmatprep.subr.mxu1 %v413_v15 }
 0x2ba   :  { %3278 = vmatpush3.msra.mxu1 %v413_v15 }
 0x2bb   :  { %3280 = vmatmul.mubr.msk.f32.vlgmr.msra.gmra.mxu1 %vm141_vm1, %v3765_v16  ;;  %3296 = vmatprep.subr.mxu1 %v3686_v45 }
 0x2bc   :  { %3282 = vmatprep.mubr.msk.f32.mxu1 %vm141_vm1, %v3770_v17  ;;  %3297 = vmatpush3.msra.mxu1 %v3686_v45 }
 0x2bd   :  { %3298 = vmatprep.subr.mxu1 %v3688_v46 }
 0x2be   :  { %3299 = vmatpush3.msra.mxu1 %v3688_v46 }
 0x2bf   :  { %3283 = vmatmul.mubr.msk.f32.gmra.mxu1 %vm141_vm1, %v3780_v18  ;;  %3310 = vmatprep.subr.mxu1 %v4394_v22 }
 0x2c0   :  { %3300 = vmatprep.mubr.msk.f32.mxu1 %vm141_vm1, %v3787_v19 }
 0x2c3   :  { %3301 = vmatmul.mubr.msk.f32.vlgmr.msra.gmra.mxu1 %vm141_vm1, %v3795_v20 }
 0x2c4   :  { %3318 = vmatprep.mubr.msk.f32.mxu1 %vm3505_vm5, %v4394_v22  ;;  %3311 = vmatpush3.msra.mxu1 %v3865_v11 }
 0x2c5   :  { %3312 = vmatprep.subr.mxu1 %v4394_v22 }
 0x2c6   :  { %3313 = vmatpush3.msra.mxu1 %v3870_v12 }
 0x2c7   :  { %3314 = vmatprep.subr.mxu1 %v4394_v22 }
 0x2c8   :  { %3315 = vmatpush3.msra.mxu1 %v3877_v14 }
 0x2c9   :  { %3316 = vmatprep.subr.mxu1 %v4394_v22 }
 0x37b   :  { %v3281_v24 = vpop.f32.mrf.mxu1 }
 0x37c   :  { %v534_v31 = vadd.f32 %v3281_v24, %v3812_v29  ;;  %v3886_v24 = vld [vmem:[%s4373_s17] sm:$0xff] }
 0x37d   :  { %v528_v26 = vpop.f32.mrf.mxu1  ;;  %3317 = vmatpush3.msra.mxu1 %v3886_v24 }
 0x37e   :  { %v529_v36 = vadd.f32 %v528_v26, %v3816_v34  ;;  %v548_v39 = vmax.f32 %v534_v31, 0.0 }
 0x37f   :  { %v3284_v27 = vpop.f32.mrf.mxu1 }
 0x380   :  { %v544_v28 = vadd.f32 %v3284_v27, %v3803_v23  ;;  %v547_v41 = vmax.f32 %v529_v36, 0.0  ;;  %v3894_v27 = vld [vmem:[%s4374_s16] ss:$0 sm:$0xff] }
 0x381   :  { %v538_v30 = vpop.f32.mrf.mxu1  ;;  %4430 = vst [vmem:[#allocation10_spill] sm:$0xff] %v3894_v27 }
 0x382   :  { %v550_v32 = vmax.f32 %v544_v28, 0.0  ;;  %v539_v33 = vadd.f32 %v538_v30, %v3805_v25 }
 0x383   :  { %v3302_v35 = vpop.f32.mrf.mxu1 }
 0x384   :  { %v549_v37 = vmax.f32 %v539_v33, 0.0  ;;  %3286 = vmatpush3.msra.mxu0 %v550_v32  ;;  %736 = vrot.lane.b32.xlu1 %v3302_v35, %s3506_s1  ;;  %v723_v40 = vrot.slane %v3302_v35, 4  ;;  %v3901_v33 = vld [vmem:[%s4375_s18] ss:$0 sm:$0xff]  ;;  %s3511_s18 = smov 120  }
 0x385   :  { %3287 = vmatprep.subr.mxu0 %v4394_v22  ;;  %v705_v38 = vpop.f32.mrf.mxu1  ;;  %4431 = vst [vmem:[#allocation11_spill] sm:$0xff] %v3901_v33 }
 0x386   :  { %732 = vrot.lane.b32.xlu0 %v705_v38, %s3507_s24  ;;  %3288 = vmatpush3.msra.mxu0 %v549_v37  ;;  %v715_v42 = vrot.slane %v705_v38, 4  ;;  %v3907_v37 = vld [vmem:[%s4376_s4] sm:$0xff] }
 0x387   :  { %3289 = vmatprep.subr.mxu0 %v4394_v22  ;;  %4432 = vst [vmem:[#allocation12_spill] sm:$0xff] %v3907_v37 }
 0x388   :  { %739 = vrot.lane.b32.xlu1 %v723_v40, %s3508_s25  ;;  %3290 = vmatpush3.msra.mxu0 %v548_v39 }
 0x389   :  { %3291 = vmatprep.subr.mxu0 %v4394_v22 }
 0x38a   :  { %716 = vrot.lane.b32.xlu0 %v715_v42, %s3506_s1  ;;  %3292 = vmatpush3.msra.mxu0 %v547_v41 }
 0x38b   :  { %3294 = vmatmul.mubr.msk.f32.vlgmr.msra.gmra.mxu0 %vm257_vm4, %v3827_v44  ;;  %3303 = vmatprep.subr.mxu0 %v4394_v22 }
 0x38c   :  { %724 = vrot.lane.b32.xlu1 %v723_v40, %s3509_s12  ;;  %3304 = vmatpush3.msra.mxu0 %v3833_v52 }
 0x38d   :  { %3305 = vmatprep.subr.mxu0 %v4394_v22  ;;  %3307 = vmatprep.mubr.msk.f32.mxu0 %vm3505_vm5, %v4394_v22 }
 0x38e   :  { %720 = vrot.lane.b32.xlu0 %v3302_v35, %s3508_s25  ;;  %3306 = vmatpush3.msra.mxu0 %v3842_v54 }
 0x38f   :  { %3321 = vmatprep.subr.mxu0 %v4394_v22 }
 0x3f6   :  { %v737_v55 = vpop.permute.xlu1 %736 }
 0x3f8   :  { %v733_v56 = vpop.permute.xlu0 %732 }
 0x3f9   :  { %v742_v58 = vsel %vm727_vm6, %v733_v56, %v715_v42 }
 0x3fa   :  { %v740_v59 = vpop.permute.xlu1 %739  ;;  %v743_v60 = vsel %vm76_vm0, %v742_v58, %v737_v55 }
 0x3fb   :  { %v744_v63 = vsel %vm730_vm7, %v743_v60, %v740_v59 }
 0x3fc   :  { %v717_v61 = vpop.permute.xlu0 %716  ;;  %v746_v3 = vrot.slane %v744_v63, 4 }
 0x3fd   :  { %v728_v0 = vsel %vm727_vm6, %v705_v38, %v717_v61 }
 0x3fe   :  { %v725_v5 = vpop.permute.xlu1 %724 }
 0x400   :  { %v721_v1 = vpop.permute.xlu0 %720 }
 0x401   :  { %v729_v7 = vsel %vm76_vm0, %v728_v0, %v721_v1 }
 0x402   :  { %v731_v8 = vsel %vm730_vm7, %v729_v7, %v725_v5 }
 0x403   :  { %v749_v10 = vsel %vm748_vm8, %v731_v8, %v746_v3 }
 0x404   :  { %3308 = vmatmul.mubr.msk.f32.vlgmr.msra.gmra.mxu0 %vm141_vm1, %v749_v10 }
 0x405   :  { %3323 = vmatprep.mubr.msk.f32.mxu0 %vm3505_vm5, %v4394_v22 }
 0x44b   :  { %v3879_v15 = vpop.f32.mrf.mxu0 }
 0x44c   :  { %4429 = vst [vmem:[#allocation9_spill] sm:$0xff] %v3879_v15 }
 0x44d   :  { %v3295_v26 = vpop.f32.mrf.mxu0 }
 0x4c4   :  { %v828_v28 = vpop.f32.mrf.mxu0 }
 0x4c5   :  { %v829_v30 = vadd.f32 %v3894_v27, %v828_v28 }
 0x4c6   :  { %v3309_v31 = vpop.f32.mrf.mxu0 }
 0x4c7   :  { %3487 = vtanh.f32 %v829_v30 }
 0x4d4   :  { %v3488_v32 = vpop.eup %3487 }
 0x4d5   :  { %3319 = vmatmul.mubr.msk.f32.vlgmr.msra.gmra.mxu1 %vm257_vm4, %v3488_v32 }
 0x595   :  { %v913_v35 = vpop.f32.mrf.mxu1 }
 0x596   :  { %v914_v36 = vadd.f32 %v3901_v33, %v913_v35 }
 0x597   :  { %v3320_v38 = vpop.f32.mrf.mxu1 }
 0x598   :  { %3322 = vmatpush3.msra.mxu0 %v914_v36 }
 0x599   :  { %3324 = vmatmul.mubr.msk.f32.vlgmr.msra.gmra.mxu0 %vm76_vm0, %v3907_v37 }
 0x659   :  { %v3911_v39 = vpop.f32.mrf.mxu0 }
 0x65a   :  { %v991_v40 = vmul.f32 %v3911_v39, %v3911_v39  ;;  %v3916_v41 = vrot.slane %v3911_v39, 2  ;;  %v3925_v61 = vrot.slane %v3911_v39, 4 }
 0x65b   :  { %v3325_v42 = vpop.f32.mrf.mxu0 }
 0x65c   :  { %v1010_v55 = vsel %vm1009_vm9, %v991_v40, 0.0  ;;  %v993_v56 = vsel %vm992_vm10, %v991_v40, 0.0  ;;  %v999_v58 = vmul.f32 %v3916_v41, %v3911_v39  ;;  %v1017_v59 = vsel %vm1016_vm11, %v991_v40, 0.0 }
 0x65d   :  { %1011 = vadd.xlane.f32.xlu0 %v1010_v55  ;;  %994 = vadd.xlane.f32.xlu1 %v993_v56  ;;  %v1005_v1 = vmul.f32 %v3925_v61, %v3911_v39 }
 0x65e   :  { %v1000_v60 = vsel %vm992_vm10, %v999_v58, 0.0  ;;  %v1013_v63 = vsel %vm1009_vm9, %v999_v58, 0.0  ;;  %v1179_v0 = vsel %vm1178_vm12, %v999_v58, 0.0 }
 0x65f   :  { %v1006_v3 = vsel %vm992_vm10, %v1005_v1, 0.0  ;;  %v1182_v5 = vsel %vm1178_vm12, %v1005_v1, 0.0 }
 0x661   :  { %1018 = vadd.xlane.f32.xlu0 %v1017_v59  ;;  %1001 = vadd.xlane.f32.xlu1 %v1000_v60 }
 0x665   :  { %1014 = vadd.xlane.f32.xlu0 %v1013_v63  ;;  %1180 = vadd.xlane.f32.xlu1 %v1179_v0 }
 0x669   :  { %1007 = vadd.xlane.f32.xlu0 %v1006_v3 }
 0x66d   :  { %1183 = vadd.xlane.f32.xlu0 %v1182_v5 }
 0x6e6   :  { %v3933_v7 = vpop.xlane.xlu0 %1011  ;;  %v3936_v10 = vpop.xlane.xlu1 %994 }
 0x6e7   :  { %v1021_v8 = vrot.slane %v3933_v7, 2 }
 0x6e9   :  { %v1023_v28 = vadd.f32 %v1021_v8, %v3936_v10 }
 0x6ea   :  { %v3938_v26 = vpop.xlane.xlu0 %1018  ;;  %v3948_v59 = vpop.xlane.xlu1 %1001 }
 0x6eb   :  { %v1025_v30 = vrot.slane %v3938_v26, 4 }
 0x6ed   :  { %v1027_v31 = vadd.f32 %v1025_v30, %v1023_v28 }
 0x6ee   :  { %v3942_v32 = vpop.xlane.xlu0 %1014 }
 0x6ef   :  { %v1028_v35 = vmul.f32 0.0001, %v1027_v31  ;;  %v1046_v56 = vrot.slane %v3942_v32, 2  ;;  %v1043_v30 = vmul.f32 %v3942_v32, %v3942_v32 }
 0x6f1   :  { %v1029_v36 = vmul.f32 0.33333334, %v1028_v35  ;;  %v1053_v21 = vmul.f32 %v1046_v56, %v3948_v59 }
 0x6f2   :  { %v3944_v40 = vpop.xlane.xlu0 %1007 }
 0x6f3   :  { %v1030_v38 = vadd.f32 1e-06, %v1029_v36  ;;  %v1062_v63 = vmul.f32 %v3944_v40, %v3948_v59  ;;  %v1048_v35 = vmul.f32 %v1046_v56, %v3944_v40 }
 0x6f5   :  { %v1031_v42 = vadd.f32 %v1030_v38, %v3936_v10  ;;  %v1036_v55 = vrot.slane %v1030_v38, 4  ;;  %v1033_v58 = vrot.slane %v1030_v38, 6 }
 0x6f7   :  { %v1038_v60 = vadd.f32 %v1036_v55, %v3938_v26  ;;  %v1063_v0 = vmul.f32 %v1046_v56, %v1031_v42  ;;  %v1035_v1 = vadd.f32 %v1033_v58, %v3933_v7  ;;  %v1066_v56 = vmul.f32 %v3948_v59, %v3948_v59 }
 0x6f9   :  { %v1040_v3 = vrot.slane %v1038_v60, 2  ;;  %v1049_v5 = vrot.slane %v1038_v60, 4  ;;  %v1064_v8 = vsub.f32 %v1062_v63, %v1063_v0  ;;  %v1055_v28 = vrot.slane %v1035_v1, 2 }
 0x6fb   :  { %1123 = vperm.xlu0 %3481, %v1064_v8   ;;  %v1042_v31 = vmul.f32 %v1040_v3, %v1035_v1  ;;  %v1051_v36 = vmul.f32 %v1049_v5, %v3948_v59  ;;  %v1057_v38 = vmul.f32 %v1055_v28, %v3944_v40  ;;  %v1059_v43 = vmul.f32 %v1049_v5, %v1031_v42 }
 0x6fc   :  { %v1060_v3 = vmul.f32 %v3944_v40, %v3944_v40 }
 0x6fd   :  { %v1044_v55 = vsub.f32 %v1042_v31, %v1043_v30  ;;  %v1052_v22 = vsub.f32 %v1048_v35, %v1051_v36  ;;  %v1058_v60 = vsub.f32 %v1053_v21, %v1057_v38  ;;  %v1065_v31 = vmul.f32 %v1055_v28, %v1031_v42  ;;  %v1184_v28 = vpop.xlane.xlu0 %1183 }
 0x6fe   :  { %v1061_v30 = vsub.f32 %v1059_v43, %v1060_v3  ;;  %v3972_v43 = vpop.xlane.xlu1 %1180 }
 0x6ff   :  { %v1069_v58 = vrot.slane %v1044_v55, 2  ;;  %1079 = vperm.xlu0 %3481, %v1044_v55   ;;  %1085 = vperm.xlu1 %3482, %v1052_v22   ;;  %v1072_v0 = vmul.f32 %v1052_v22, %v3948_v59  ;;  %v1074_v1 = vmul.f32 %v1058_v60, %v3944_v40  ;;  %v1067_v21 = vsub.f32 %v1065_v31, %v1066_v56 }
 0x700   :  { %v3967_v22 = vrot.slane %v3911_v39, 6 }
 0x701   :  { %v1071_v63 = vmul.f32 %v1069_v58, %v1031_v42 }
 0x702   :  { %v1185_v5 = vmul.f32 %v3967_v22, %v3911_v39 }
 0x703   :  { %v1073_v8 = vadd.f32 %v1072_v0, %v1071_v63  ;;  %1095 = vperm.xlu1 %3482, %v1058_v60  }
 0x704   :  { %v1186_v36 = vsel %vm1178_vm12, %v1185_v5, 0.0 }
 0x705   :  { %v1075_v15 = vadd.f32 %v1074_v1, %v1073_v8 }
 0x707   :  { %3489 = vrcp.f32 %v1075_v15  ;;  %1116 = vperm.xlu1 %3482, %v1061_v30  }
 0x70b   :  { %1134 = vperm.xlu1 %3482, %v1067_v21  }
 0x714   :  { %v3490_v35 = vpop.eup %3489 }
 0x715   :  { %1107 = vperm.xlu0 %3481, %v3490_v35  }
 0x72f   :  { %1187 = vadd.xlane.f32.xlu1 %v1186_v36 }
 0x776   :  { %v1124_v55 = vpop.permute.xlu0 %1123 }
 0x777   :  { %v1130_v30 = vmul.f32 %v1124_v55, %v3925_v61  ;;  %v1126_v35 = vmul.f32 %v1124_v55, %v3967_v22 }
 0x77a   :  { %v1086_v15 = vpop.permute.xlu1 %1085  ;;  %v1080_v3 = vpop.permute.xlu0 %1079 }
 0x77b   :  { %v1088_v58 = vmul.f32 %v1086_v15, %v3925_v61  ;;  %v1113_v0 = vmul.f32 %v1086_v15, %v3916_v41  ;;  %v1082_v5 = vmul.f32 %v1080_v3, %v3911_v39 }
 0x77d   :  { %v1090_v31 = vrot.slane %v1088_v58, 6 }
 0x77e   :  { %v1096_v42 = vpop.permute.xlu1 %1095 }
 0x77f   :  { %v1100_v8 = vmul.f32 %v3967_v22, %v1096_v42  ;;  %v1129_v1 = vmul.f32 %v1096_v42, %v3916_v41  ;;  %v1092_v37 = vadd.f32 %v1090_v31, %v1082_v5 }
 0x781   :  { %v1102_v36 = vrot.slane %v1100_v8, 6 }
 0x782   :  { %v1117_v38 = vpop.permute.xlu1 %1116 }
 0x783   :  { %v1119_v60 = vmul.f32 %v1117_v38, %v3925_v61  ;;  %v1131_v38 = vadd.f32 %v1130_v30, %v1129_v1  ;;  %v1104_v54 = vadd.f32 %v1102_v36, %v1092_v37 }
 0x785   :  { %v1120_v56 = vadd.f32 %v1119_v60, %v1113_v0 }
 0x786   :  { %v1135_v63 = vpop.permute.xlu1 %1134 }
 0x787   :  { %v1137_v21 = vmul.f32 %v1135_v63, %v3967_v22  ;;  %v1127_v33 = vadd.f32 %v1126_v35, %v1120_v56 }
 0x789   :  { %v1138_v15 = vadd.f32 %v1137_v21, %v1131_v38 }
 0x790   :  { %v1108_v27 = vpop.permute.xlu0 %1107 }
 0x791   :  { %v1110_v52 = vrot.slane %v1108_v27, 6  ;;  %v1128_v42 = vmul.f32 %v1127_v33, %v1108_v27  ;;  %v1139_v44 = vmul.f32 %v1138_v15, %v1108_v27 }
 0x793   :  { %v1112_v34 = vmul.f32 %v1110_v52, %v1104_v54  ;;  %v1150_v25 = vrot.slane %v1128_v42, 6  ;;  %v1158_v58 = vrot.slane %v1139_v44, 6  ;;  %v1171_v60 = vrot.slane %v1139_v44, 4 }
 0x794   :  { %v1144_v8 = vmul.f32 %v1128_v42, %v3948_v59  ;;  %v1146_v31 = vmul.f32 %v1139_v44, %v3944_v40 }
 0x795   :  { %v1141_v0 = vrot.slane %v1112_v34, 2  ;;  %v1152_v63 = vmul.f32 %v1150_v25, %v3933_v7  ;;  %v1166_v55 = vmul.f32 %v1150_v25, %v3942_v32  ;;  %v1160_v1 = vmul.f32 %v1158_v58, %v3942_v32 }
 0x796   :  { %v1173_v3 = vmul.f32 %v1171_v60, %v3938_v26  ;;  %v1192_v58 = vrot.slane %v1128_v42, 2 }
 0x797   :  { %v1143_v37 = vmul.f32 %v1141_v0, %v3936_v10  ;;  %v1148_v33 = vmul.f32 %v1141_v0, %v3948_v59  ;;  %v1154_v27 = vrot.slane %v1152_v63, 2  ;;  %v1168_v52 = vrot.slane %v1166_v55, 2 }
 0x798   :  { %v1165_v54 = vmul.f32 %v1141_v0, %v3944_v40  ;;  %v1162_v56 = vrot.slane %v1160_v1, 2  ;;  %v1175_v21 = vrot.slane %v1173_v3, 4  ;;  %v1189_v40 = vrot.slane %v1112_v34, 4 }
 0x799   :  { %v1145_v30 = vadd.f32 %v1144_v8, %v1143_v37  ;;  %v1156_v7 = vadd.f32 %v1154_v27, %v1148_v33  ;;  %v1194_v0 = vmul.f32 %v1192_v58, %v1184_v28  ;;  %v1196_v63 = vrot.slane %v1139_v44, 2  ;;  %v4006_v44 = vld [vmem:[%s4377_s5] sm:$0xff] }
 0x79a   :  { %v1170_v25 = vadd.f32 %v1168_v52, %v1165_v54  ;;  %v1191_v60 = vmul.f32 %v1189_v40, %v3972_v43  ;;  %3330 = vmatprep.mubr.msk.f32.mxu0 %vm730_vm7, %v4006_v44 }
 0x79b   :  { %v1147_v35 = vadd.f32 %v1146_v31, %v1145_v30  ;;  %v1164_v5 = vadd.f32 %v1162_v56, %v1156_v7 }
 0x79c   :  { %v1177_v32 = vadd.f32 %v1175_v21, %v1170_v25  ;;  %v1195_v8 = vadd.f32 %v1194_v0, %v1191_v60  ;;  %v4016_v25 = vld [vmem:[%s4377_s5 + $0x8] sm:$0xf] }
 0x79d   :  { %v1218_v26 = vrot.slane %v1147_v35, 6  ;;  %v1221_v36 = vrot.slane %v1164_v5, 4  ;;  %v4023_v21 = vld [vmem:[%s4378_s19 + $0x8] sm:$0xff]  ;;  %v4030_v35 = vld [vmem:[%s4378_s19] sm:$0xff] }
 0x79e   :  { %v1224_v10 = vrot.slane %v1177_v32, 2  ;;  %3333 = vmatprep.subr.mxu1 %v4023_v21 }
 0x79f   :  { %v1233_v59 = vsel %vm1232_vm13, %v3911_v39, %v1218_v26  ;;  %3334 = vmatpush3.msra.mxu1 %v4023_v21  ;;  %v4039_v26 = vld [vmem:[%s4379_s21 + $0x18] sm:$0xff] }
 0x7a0   :  { %v1234_v38 = vsel %vm748_vm8, %v1233_v59, %v1221_v36  ;;  %3335 = vmatprep.subr.mxu1 %v4030_v35  ;;  %v4044_v36 = vld [vmem:[%s4379_s21 + $0x10] sm:$0xff]  ;;  %v4058_v59 = vld [vmem:[%s4379_s21] sm:$0xff] }
 0x7a1   :  { %v1236_v15 = vsel %vm1235_vm14, %v1234_v38, %v1224_v10  ;;  %3336 = vmatpush3.msra.mxu1 %v4030_v35  ;;  %v4051_v10 = vld [vmem:[%s4379_s21 + $0x8] sm:$0xff]  ;;  %v4067_v38 = vld [vmem:[%s4380_s20] ss:$0 sm:$0xff] }
 0x7b8   :  { %v1188_v55 = vpop.xlane.xlu1 %1187 }
 0x7b9   :  { %v1198_v1 = vmul.f32 %v1196_v63, %v1188_v55 }
 0x7bb   :  { %v1199_v3 = vadd.f32 %v1198_v1, %v1195_v8  ;;  %v4078_v8 = vld [vmem:[%s4381_s22] ss:$0 sm:$0xff] }
 0x7bd   :  { %v1208_v37 = vmul.f32 %v1199_v3, %v3967_v22  ;;  %v1200_v33 = vmul.f32 %v1199_v3, %v3916_v41  ;;  %v1204_v52 = vmul.f32 %v1199_v3, %v3925_v61  ;;  %v1227_v7 = vrot.slane %v1199_v3, 6 }
 0x7bf   :  { %v1209_v39 = vsel %vm1178_vm12, %v1208_v37, 0.0  ;;  %v1201_v27 = vsel %vm1178_vm12, %v1200_v33, 0.0  ;;  %v1205_v34 = vsel %vm1178_vm12, %v1204_v52, 0.0  ;;  %v1578_v37 = vld [vmem:[%s4382_s2] sm:$0xff] }
 0x7c0   :  { %1210 = vadd.xlane.f32.xlu1 %v1209_v39  ;;  %1202 = vadd.xlane.f32.xlu0 %v1201_v27 }
 0x7c4   :  { %1206 = vadd.xlane.f32.xlu0 %v1205_v34 }
 0x849   :  { %v1203_v41 = vpop.xlane.xlu0 %1202  ;;  %v1211_v22 = vpop.xlane.xlu1 %1210 }
 0x84a   :  { %v1212_v28 = vmul.f32 %v1203_v41, %v1189_v40  ;;  %v1215_v54 = vmul.f32 %v1211_v22, %v1196_v63 }
 0x84d   :  { %v1207_v43 = vpop.xlane.xlu0 %1206 }
 0x84e   :  { %v1213_v42 = vmul.f32 %v1207_v43, %v1192_v58 }
 0x850   :  { %v1214_v61 = vadd.f32 %v1213_v42, %v1212_v28 }
 0x852   :  { %v1216_v30 = vadd.f32 %v1215_v54, %v1214_v61 }
 0x854   :  { %v1230_v31 = vrot.slane %v1216_v30, 4 }
 0x856   :  { %v1237_v56 = vsel %vm1232_vm13, %v1227_v7, %v1230_v31 }
 0x857   :  { %3326 = vmatprep.subr.msk.mxu0 %vm748_vm8, %v1237_v56 }
 0x858   :  { %3327 = vmatpush3.msk.msra.mxu0 %vm748_vm8, %v1237_v56 }
 0x859   :  { %3328 = vmatprep.subr.mxu0 %v1236_v15 }
 0x85a   :  { %3329 = vmatpush3.msra.mxu0 %v1236_v15 }
 0x85b   :  { %3331 = vmatmul.mubr.msk.f32.vlgmr.msra.gmra.mxu0 %vm730_vm7, %v4016_v25  ;;  %3340 = vmatprep.subr.mxu0 %v4039_v26 }
 0x85c   :  { %3341 = vmatpush3.msra.mxu0 %v4039_v26 }
 0x85d   :  { %3342 = vmatprep.subr.mxu0 %v4044_v36 }
 0x85e   :  { %3343 = vmatpush3.msra.mxu0 %v4044_v36 }
 0x85f   :  { %3344 = vmatprep.subr.mxu0 %v4051_v10 }
 0x860   :  { %3345 = vmatpush3.msra.mxu0 %v4051_v10 }
 0x861   :  { %3346 = vmatprep.subr.mxu0 %v4058_v59 }
 0x862   :  { %3347 = vmatpush3.msra.mxu0 %v4058_v59 }
 0x91b   :  { %v3332_v5 = vpop.f32.mrf.mxu0 }
 0x91d   :  { %v1315_v32 = vpop.f32.mrf.mxu0 }
 0x91e   :  { %3337 = vmatprep.mubr.msk.f32.mxu1 %vm141_vm1, %v1315_v32 }
 0x91f   :  { %3338 = vmatmul.mubr.msk.f32.vlgmr.msra.gmra.mxu1 %vm141_vm1, %v3332_v5 }
 0x920   :  { %3355 = vmatprep.mubr.msk.f32.mxu1 %vm141_vm1, %v1578_v37 }
 0x9df   :  { %v3339_v15 = vpop.f32.mrf.mxu1 }
 0x9e0   :  { %v1411_v40 = vadd.f32 %v3339_v15, %v4067_v38  ;;  %v1579_v15 = vld [vmem:[%s4382_s2 + $0x8] sm:$0xff] }
 0x9e1   :  { %v1405_v58 = vpop.f32.mrf.mxu1 }
 0x9e2   :  { %v1406_v60 = vadd.f32 %v4067_v38, %v1405_v58  ;;  %v4433_v58 = vmov 0.0  }
 0x9e4   :  { %3491 = vtanh.f32 %v1406_v60 }
 0x9e5   :  { %3493 = vtanh.f32 %v1411_v40 }
 0x9f1   :  { %v3492_v0 = vpop.eup %3491 }
 0x9f2   :  { %v3494_v63 = vpop.eup %3493  ;;  %3348 = vmatprep.mubr.msk.f32.mxu0 %vm257_vm4, %v3492_v0 }
 0x9f3   :  { %3349 = vmatmul.mubr.msk.f32.vlgmr.msra.gmra.mxu0 %vm257_vm4, %v3494_v63 }
 0x9f4   :  { %3367 = vmatprep.mubr.msk.f32.mxu0 %vm141_vm1, %v3641_v2 }
 0xab3   :  { %v3350_v55 = vpop.f32.mrf.mxu0 }
 0xab4   :  { %v1505_v33 = vadd.f32 %v3350_v55, %v4078_v8 }
 0xab5   :  { %v1499_v1 = vpop.f32.mrf.mxu0 }
 0xab6   :  { %v1500_v3 = vadd.f32 %v4078_v8, %v1499_v1  ;;  %v1515_v39 = vrot.slane %v1505_v33, 2 }
 0xab8   :  { %1520 = vrot.lane.b32.xlu1 %v1500_v3, %s3507_s24  ;;  %1544 = vrot.lane.b32.xlu0 %v1500_v3, %s3510_s28  ;;  %v1509_v2 = vrot.slane %v1500_v3, 4 }
 0xabc   :  { %1530 = vrot.lane.b32.xlu0 %v1500_v3, %s3511_s18  ;;  %1547 = vrot.lane.b32.xlu1 %v1509_v2, %s3511_s18 }
 0xac0   :  { %1510 = vrot.lane.b32.xlu0 %v1509_v2, %s3506_s1  ;;  %1533 = vrot.lane.b32.xlu1 %v1509_v2, %s3507_s24 }
 0xac4   :  { %1537 = vrot.lane.b32.xlu0 %v1505_v33, %s3511_s18  ;;  %1525 = vrot.lane.b32.xlu1 %v1505_v33, %s3507_s24 }
 0xac8   :  { %1516 = vrot.lane.b32.xlu0 %v1515_v39, %s3506_s1  ;;  %1540 = vrot.lane.b32.xlu1 %v1515_v39, %s3507_s24 }
 0xacc   :  { %1554 = vrot.lane.b32.xlu0 %v1515_v39, %s3511_s18  ;;  %1551 = vrot.lane.b32.xlu1 %v1505_v33, %s3510_s28 }
 0xb2a   :  { %v1521_v27 = vpop.permute.xlu1 %1520  ;;  %v1545_v52 = vpop.permute.xlu0 %1544 }
 0xb2b   :  { %v1524_v43 = vsel %vm727_vm6, %v1521_v27, %v1509_v2 }
 0xb2c   :  { %v1559_v31 = vrot.slane %v1524_v43, 4 }
 0xb2e   :  { %v1531_v34 = vpop.permute.xlu0 %1530  ;;  %v1548_v41 = vpop.permute.xlu1 %1547 }
 0xb2f   :  { %v1550_v22 = vsel %vm727_vm6, %v1545_v52, %v1548_v41 }
 0xb30   :  { %v1562_v28 = vrot.slane %v1550_v22, 4 }
 0xb32   :  { %v1511_v42 = vpop.permute.xlu0 %1510  ;;  %v1534_v54 = vpop.permute.xlu1 %1533 }
 0xb33   :  { %v1513_v61 = vsel %vm727_vm6, %v1500_v3, %v1511_v42  ;;  %v1536_v30 = vsel %vm727_vm6, %v1531_v34, %v1534_v54 }
 0xb34   :  { %v1565_v7 = vsel %vm748_vm8, %v1536_v30, %v1562_v28  ;;  %v1564_v32 = vsel %vm748_vm8, %v1513_v61, %v1559_v31 }
 0xb35   :  { %3351 = vmatprep.subr.mxu1 %v1565_v7 }
 0xb36   :  { %v1538_v56 = vpop.permute.xlu0 %1537  ;;  %3352 = vmatpush3.msra.mxu1 %v1565_v7  ;;  %v1526_v5 = vpop.permute.xlu1 %1525 }
 0xb37   :  { %3353 = vmatprep.subr.mxu1 %v1564_v32  ;;  %v1529_v40 = vsel %vm727_vm6, %v1526_v5, %v1515_v39 }
 0xb38   :  { %3354 = vmatpush3.msra.mxu1 %v1564_v32  ;;  %v1567_v1 = vrot.slane %v1529_v40, 6 }
 0xb39   :  { %3356 = vmatmul.mubr.msk.f32.vlgmr.msra.gmra.mxu1 %vm141_vm1, %v1579_v15  ;;  %3358 = vmatprep.subr.mxu1 %v4433_v58 }
 0xb3a   :  { %v1517_v60 = vpop.permute.xlu0 %1516  ;;  %v1541_v0 = vpop.permute.xlu1 %1540  ;;  %3360 = vmatprep.mubr.msk.f32.mxu1 %vm3505_vm5, %v4433_v58 }
 0xb3b   :  { %v1519_v63 = vsel %vm727_vm6, %v1505_v33, %v1517_v60  ;;  %v1543_v55 = vsel %vm727_vm6, %v1538_v56, %v1541_v0  ;;  %v4435_v0 = vld [vmem:[#allocation5_spill] sm:$0xff] }
 0xb3c   :  { %v1570_v3 = vrot.slane %v1543_v55, 4  ;;  %v1575_v37 = vsel %vm1232_vm13, %v1519_v63, %v1567_v1 }
 0xb3e   :  { %v1555_v2 = vpop.permute.xlu0 %1554  ;;  %v1552_v27 = vpop.permute.xlu1 %1551  ;;  %v1576_v34 = vsel %vm748_vm8, %v1575_v37, %v1570_v3  ;;  %v4436_v3 = vld [vmem:[#allocation6_spill] sm:$0xff]  ;;  %v4437_v37 = vld [vmem:[#allocation7_spill] sm:$0xff] }
 0xb3f   :  { %v1557_v39 = vsel %vm727_vm6, %v1552_v27, %v1555_v2  ;;  %v4438_v2 = vld [vmem:[#allocation8_spill] sm:$0xff] }
 0xb40   :  { %v1573_v52 = vrot.slane %v1557_v39, 2 }
 0xb42   :  { %v1577_v41 = vsel %vm1235_vm14, %v1576_v34, %v1573_v52 }
 0xb43   :  { %3359 = vmatpush3.msra.mxu1 %v1577_v41 }
 0xbf9   :  { %v3357_v22 = vpop.f32.mrf.mxu1 }
 0xbfa   :  { %v1736_v43 = vsub.f32 %v3686_v45, %v3357_v22  ;;  %v4129_v45 = vld [vmem:[%s4383_s3] sm:$0xff] }
 0xbfb   :  { %v1652_v33 = vpop.f32.mrf.mxu1  ;;  %3361 = vmatmul.mubr.msk.f32.vlgmr.msra.gmra.mxu1 %vm76_vm0, %v4129_v45 }
 0xbfc   :  { %v1735_v28 = vsub.f32 %v3688_v46, %v1652_v33  ;;  %3363 = vmatprep.subr.mxu0 %v1736_v43  ;;  %3381 = vmatprep.mubr.msk.f32.mxu1 %vm257_vm4, %v3718_v50 }
 0xbfd   :  { %3364 = vmatpush3.msra.mxu0 %v1736_v43 }
 0xbfe   :  { %3365 = vmatprep.subr.mxu0 %v1735_v28 }
 0xbff   :  { %3366 = vmatpush3.msra.mxu0 %v1735_v28 }
 0xc00   :  { %3368 = vmatmul.mubr.msk.f32.vlgmr.msra.gmra.mxu0 %vm141_vm1, %v3695_v47 }
 0xc01   :  { %3370 = vmatprep.mubr.msk.f32.mxu0 %vm141_vm1, %v3701_v48 }
 0xc04   :  { %3371 = vmatmul.mubr.msk.f32.gmra.mxu0 %vm141_vm1, %v3711_v49 }
 0xcc0   :  { %v3369_v46 = vpop.f32.mrf.mxu0 }
 0xcc1   :  { %v1811_v61 = vadd.f32 %v3369_v46, %v3724_v53 }
 0xcc2   :  { %v1805_v42 = vpop.f32.mrf.mxu0 }
 0xcc3   :  { %v1806_v31 = vadd.f32 %v1805_v42, %v3731_v62  ;;  %v1825_v56 = vmax.f32 %v1811_v61, 0.0 }
 0xcc4   :  { %v3372_v47 = vpop.f32.mrf.mxu0 }
 0xcc5   :  { %v1821_v54 = vadd.f32 %v3372_v47, %v3722_v51  ;;  %v1824_v50 = vmax.f32 %v1806_v31, 0.0  ;;  %v4143_v51 = vpop.f32.mrf.mxu1  ;;  %v4439_v31 = vld [vmem:[#allocation10_spill] sm:$0xff] }
 0xcc6   :  { %v1815_v48 = vpop.f32.mrf.mxu0 }
 0xcc7   :  { %v1827_v49 = vmax.f32 %v1821_v54, 0.0  ;;  %v1816_v30 = vadd.f32 %v1815_v48, %v3727_v57  ;;  %v3362_v53 = vpop.f32.mrf.mxu1  ;;  %v3107_v57 = vld [vmem:[%s4422_s11 + $0x10] sm:$0xff] }
 0xcc8   :  { %3388 = vmatprep.mubr.msk.f32.mxu0 %vm141_vm1, %v3107_v57  ;;  %v4440_v57 = vld [vmem:[#allocation11_spill] sm:$0xff] }
 0xcc9   :  { %v1826_v7 = vmax.f32 %v1816_v30, 0.0  ;;  %3373 = vmatprep.subr.mxu1 %v1827_v49 }
 0xcca   :  { %3374 = vmatpush3.msra.mxu1 %v1827_v49 }
 0xccb   :  { %3375 = vmatprep.subr.mxu1 %v1826_v7 }
 0xccc   :  { %3376 = vmatpush3.msra.mxu1 %v1826_v7 }
 0xccd   :  { %3377 = vmatprep.subr.mxu1 %v1825_v56 }
 0xcce   :  { %3378 = vmatpush3.msra.mxu1 %v1825_v56 }
 0xccf   :  { %3379 = vmatprep.subr.mxu1 %v1824_v50 }
 0xcd0   :  { %3380 = vmatpush3.msra.mxu1 %v1824_v50 }
 0xcd1   :  { %3382 = vmatmul.mubr.msk.f32.vlgmr.msra.gmra.mxu1 %vm257_vm4, %v3737_v4  ;;  %v3108_v4 = vld [vmem:[%s4422_s11 + $0x18] sm:$0xff] }
 0xcd2   :  { %3395 = vmatprep.mubr.msk.f32.mxu1 %vm141_vm1, %v3758_v13 }
 0xd91   :  { %v3383_v62 = vpop.f32.mrf.mxu1 }
 0xd92   :  { %v1900_v5 = vadd.f32 %v3383_v62, %v3745_v6 }
 0xd93   :  { %v1894_v32 = vpop.f32.mrf.mxu1 }
 0xd94   :  { %v1895_v15 = vadd.f32 %v1894_v32, %v3748_v9  ;;  %3384 = vmatprep.subr.mxu0 %v1900_v5  ;;  %v4441_v32 = vld [vmem:[#allocation12_spill] sm:$0xff] }
 0xd95   :  { %3385 = vmatpush3.msra.mxu0 %v1900_v5 }
 0xd96   :  { %3386 = vmatprep.subr.mxu0 %v1895_v15 }
 0xd97   :  { %3387 = vmatpush3.msra.mxu0 %v1895_v15 }
 0xd98   :  { %3389 = vmatmul.mubr.msk.f32.vlgmr.msra.gmra.mxu0 %vm141_vm1, %v3108_v4  ;;  %3401 = vmatprep.subr.mxu0 %v4433_v58 }
 0xd99   :  { %3409 = vmatprep.mubr.msk.f32.mxu0 %vm3505_vm5, %v4433_v58 }
 0xe58   :  { %v3390_v13 = vpop.f32.mrf.mxu0 }
 0xe59   :  { %3391 = vmatprep.subr.mxu1 %v3390_v13 }
 0xe5a   :  { %v1978_v6 = vpop.f32.mrf.mxu0  ;;  %3392 = vmatpush3.msra.mxu1 %v3390_v13 }
 0xe5b   :  { %3393 = vmatprep.subr.mxu1 %v1978_v6 }
 0xe5c   :  { %3394 = vmatpush3.msra.mxu1 %v1978_v6 }
 0xe5d   :  { %3396 = vmatmul.mubr.msk.f32.vlgmr.msra.gmra.mxu1 %vm141_vm1, %v3765_v16  ;;  %3412 = vmatprep.subr.mxu1 %v1736_v43 }
 0xe5e   :  { %3413 = vmatpush3.msra.mxu1 %v1736_v43  ;;  %3398 = vmatprep.mubr.msk.f32.mxu1 %vm141_vm1, %v3770_v17 }
 0xe5f   :  { %3414 = vmatprep.subr.mxu1 %v1735_v28 }
 0xe60   :  { %3415 = vmatpush3.msra.mxu1 %v1735_v28 }
 0xe61   :  { %3399 = vmatmul.mubr.msk.f32.gmra.mxu1 %vm141_vm1, %v3780_v18  ;;  %3426 = vmatprep.subr.mxu1 %v4433_v58 }
 0xe62   :  { %3416 = vmatprep.mubr.msk.f32.mxu1 %vm141_vm1, %v3787_v19 }
 0xe65   :  { %3417 = vmatmul.mubr.msk.f32.vlgmr.msra.gmra.mxu1 %vm141_vm1, %v3795_v20 }
 0xe66   :  { %3427 = vmatpush3.msra.mxu1 %v3865_v11  ;;  %3434 = vmatprep.mubr.msk.f32.mxu1 %vm3505_vm5, %v4433_v58 }
 0xe67   :  { %3428 = vmatprep.subr.mxu1 %v4433_v58 }
 0xe68   :  { %3429 = vmatpush3.msra.mxu1 %v3870_v12  ;;  %v4434_v12 = vld [vmem:[#allocation4_spill] sm:$0xff] }
 0xe69   :  { %3430 = vmatprep.subr.mxu1 %v4433_v58 }
 0xe6a   :  { %3431 = vmatpush3.msra.mxu1 %v3877_v14 }
 0xe6b   :  { %3432 = vmatprep.subr.mxu1 %v4433_v58 }
 0xe6c   :  { %3433 = vmatpush3.msra.mxu1 %v3886_v24 }
 0xe6d   :  { %3449 = vmatprep.subr.mxu1 %v4023_v21 }
 0xf1d   :  { %v3397_v9 = vpop.f32.mrf.mxu1 }
 0xf1e   :  { %v2059_v20 = vadd.f32 %v3397_v9, %v3812_v29 }
 0xf1f   :  { %v2053_v16 = vpop.f32.mrf.mxu1 }
 0xf20   :  { %v2054_v14 = vadd.f32 %v2053_v16, %v4435_v0  ;;  %v2073_v55 = vmax.f32 %v2059_v20, 0.0 }
 0xf21   :  { %v3400_v17 = vpop.f32.mrf.mxu1 }
 0xf22   :  { %v2069_v18 = vadd.f32 %v3400_v17, %v3803_v23  ;;  %v2072_v23 = vmax.f32 %v2054_v14, 0.0 }
 0xf23   :  { %v2063_v19 = vpop.f32.mrf.mxu1 }
 0xf24   :  { %v2075_v11 = vmax.f32 %v2069_v18, 0.0  ;;  %v2064_v40 = vadd.f32 %v2063_v19, %v4434_v12 }
 0xf25   :  { %v3418_v60 = vpop.f32.mrf.mxu1 }
 0xf26   :  { %v2074_v63 = vmax.f32 %v2064_v40, 0.0  ;;  %3402 = vmatpush3.msra.mxu0 %v2075_v11  ;;  %2241 = vrot.lane.b32.xlu0 %v3418_v60, %s3506_s1  ;;  %v2230_v1 = vrot.slane %v3418_v60, 4 }
 0xf27   :  { %3403 = vmatprep.subr.mxu0 %v4433_v58  ;;  %v2212_v24 = vpop.f32.mrf.mxu1 }
 0xf28   :  { %2237 = vrot.lane.b32.xlu1 %v2212_v24, %s3507_s24  ;;  %3404 = vmatpush3.msra.mxu0 %v2074_v63  ;;  %v2222_v29 = vrot.slane %v2212_v24, 4 }
 0xf29   :  { %3405 = vmatprep.subr.mxu0 %v4433_v58 }
 0xf2a   :  { %2244 = vrot.lane.b32.xlu0 %v2230_v1, %s3508_s25  ;;  %3406 = vmatpush3.msra.mxu0 %v2073_v55 }
 0xf2b   :  { %3407 = vmatprep.subr.mxu0 %v4433_v58 }
 0xf2c   :  { %2223 = vrot.lane.b32.xlu1 %v2222_v29, %s3506_s1  ;;  %3408 = vmatpush3.msra.mxu0 %v2072_v23 }
 0xf2d   :  { %3410 = vmatmul.mubr.msk.f32.vlgmr.msra.gmra.mxu0 %vm257_vm4, %v4436_v3  ;;  %3419 = vmatprep.subr.mxu0 %v4433_v58 }
 0xf2e   :  { %2231 = vrot.lane.b32.xlu0 %v2230_v1, %s3509_s12  ;;  %3420 = vmatpush3.msra.mxu0 %v4437_v37 }
 0xf2f   :  { %3421 = vmatprep.subr.mxu0 %v4433_v58  ;;  %3423 = vmatprep.mubr.msk.f32.mxu0 %vm3505_vm5, %v4433_v58 }
 0xf30   :  { %2227 = vrot.lane.b32.xlu1 %v3418_v60, %s3508_s25  ;;  %3422 = vmatpush3.msra.mxu0 %v4438_v2 }
 0xf31   :  { %3437 = vmatprep.subr.mxu0 %v4433_v58 }
 0xf98   :  { %v2242_v27 = vpop.permute.xlu0 %2241 }
 0xf9a   :  { %v2238_v39 = vpop.permute.xlu1 %2237 }
 0xf9b   :  { %v2247_v52 = vsel %vm727_vm6, %v2238_v39, %v2222_v29 }
 0xf9c   :  { %v2245_v34 = vpop.permute.xlu0 %2244  ;;  %v2248_v41 = vsel %vm76_vm0, %v2247_v52, %v2242_v27 }
 0xf9d   :  { %v2249_v43 = vsel %vm730_vm7, %v2248_v41, %v2245_v34 }
 0xf9e   :  { %v2224_v22 = vpop.permute.xlu1 %2223  ;;  %v2251_v46 = vrot.slane %v2249_v43, 4 }
 0xf9f   :  { %v2234_v33 = vsel %vm727_vm6, %v2212_v24, %v2224_v22 }
 0xfa0   :  { %v2232_v42 = vpop.permute.xlu0 %2231 }
 0xfa2   :  { %v2228_v28 = vpop.permute.xlu1 %2227 }
 0xfa3   :  { %v2235_v47 = vsel %vm76_vm0, %v2234_v33, %v2228_v28 }
 0xfa4   :  { %v2236_v54 = vsel %vm730_vm7, %v2235_v47, %v2232_v42 }
 0xfa5   :  { %v2253_v48 = vsel %vm748_vm8, %v2236_v54, %v2251_v46 }
 0xfa6   :  { %3424 = vmatmul.mubr.msk.f32.vlgmr.msra.gmra.mxu0 %vm141_vm1, %v2253_v48 }
 0xfa7   :  { %3439 = vmatprep.mubr.msk.f32.mxu0 %vm3505_vm5, %v4433_v58 }
 0xfed   :  { %v4211_v61 = vpop.f32.mrf.mxu0 }
 0xfef   :  { %v3411_v49 = vpop.f32.mrf.mxu0 }
0x1066   :  { %v2323_v30 = vpop.f32.mrf.mxu0 }
0x1067   :  { %v2324_v7 = vadd.f32 %v4439_v31, %v2323_v30 }
0x1068   :  { %v3425_v56 = vpop.f32.mrf.mxu0 }
0x1069   :  { %3495 = vtanh.f32 %v2324_v7 }
0x1076   :  { %v3496_v50 = vpop.eup %3495 }
0x1077   :  { %3435 = vmatmul.mubr.msk.f32.vlgmr.msra.gmra.mxu1 %vm257_vm4, %v3496_v50 }
0x1078   :  { %3450 = vmatpush3.msra.mxu1 %v4023_v21 }
0x1079   :  { %3451 = vmatprep.subr.mxu1 %v4030_v35 }
0x107a   :  { %3452 = vmatpush3.msra.mxu1 %v4030_v35 }
0x107b   :  { %3467 = vmatprep.subr.mxu1 %v4433_v58 }
0x1137   :  { %v2397_v53 = vpop.f32.mrf.mxu1 }
0x1138   :  { %v2398_v62 = vadd.f32 %v4440_v57, %v2397_v53 }
0x1139   :  { %v3436_v5 = vpop.f32.mrf.mxu1 }
0x113a   :  { %3438 = vmatpush3.msra.mxu0 %v2398_v62 }
0x113b   :  { %3440 = vmatmul.mubr.msk.f32.vlgmr.msra.gmra.mxu0 %vm76_vm0, %v4441_v32 }
0x113c   :  { %3446 = vmatprep.mubr.msk.f32.mxu0 %vm730_vm7, %v4006_v44 }
0x11fb   :  { %v4224_v15 = vpop.f32.mrf.mxu0 }
0x11fc   :  { %v2471_v21 = vmul.f32 %v4224_v15, %v4224_v15  ;;  %v4229_v35 = vrot.slane %v4224_v15, 2  ;;  %v4236_v16 = vrot.slane %v4224_v15, 4 }
0x11fd   :  { %v3441_v4 = vpop.f32.mrf.mxu0 }
0x11fe   :  { %v2488_v13 = vsel %vm1009_vm9, %v2471_v21, 0.0  ;;  %v2472_v6 = vsel %vm992_vm10, %v2471_v21, 0.0  ;;  %v2478_v9 = vmul.f32 %v4229_v35, %v4224_v15  ;;  %v2494_v17 = vsel %vm1016_vm11, %v2471_v21, 0.0 }
0x11ff   :  { %2489 = vadd.xlane.f32.xlu1 %v2488_v13  ;;  %2473 = vadd.xlane.f32.xlu0 %v2472_v6  ;;  %v2484_v18 = vmul.f32 %v4236_v16, %v4224_v15 }
0x1200   :  { %v2491_v44 = vsel %vm1009_vm9, %v2478_v9, 0.0  ;;  %v2479_v20 = vsel %vm992_vm10, %v2478_v9, 0.0  ;;  %v2655_v12 = vsel %vm1178_vm12, %v2478_v9, 0.0 }
0x1201   :  { %v2485_v19 = vsel %vm992_vm10, %v2484_v18, 0.0  ;;  %v2658_v11 = vsel %vm1178_vm12, %v2484_v18, 0.0 }
0x1203   :  { %2492 = vadd.xlane.f32.xlu1 %v2491_v44  ;;  %2495 = vadd.xlane.f32.xlu0 %v2494_v17 }
0x1207   :  { %2486 = vadd.xlane.f32.xlu1 %v2485_v19  ;;  %2480 = vadd.xlane.f32.xlu0 %v2479_v20  ;;  %v4280_v20 = vrot.slane %v4224_v15, 6 }
0x120b   :  { %2659 = vadd.xlane.f32.xlu1 %v2658_v11  ;;  %2656 = vadd.xlane.f32.xlu0 %v2655_v12  ;;  %v2661_v11 = vmul.f32 %v4280_v20, %v4224_v15 }
0x120d   :  { %v2662_v12 = vsel %vm1178_vm12, %v2661_v11, 0.0 }
0x1288   :  { %v4246_v40 = vpop.xlane.xlu1 %2489  ;;  %v4248_v60 = vpop.xlane.xlu0 %2473 }
0x1289   :  { %v2498_v0 = vrot.slane %v4246_v40, 2 }
0x128b   :  { %v2500_v63 = vadd.f32 %v2498_v0, %v4248_v60 }
0x128c   :  { %v4251_v14 = vpop.xlane.xlu0 %2495  ;;  %v4255_v1 = vpop.xlane.xlu1 %2492 }
0x128d   :  { %v2502_v24 = vrot.slane %v4251_v14, 4  ;;  %v2523_v27 = vrot.slane %v4255_v1, 2  ;;  %v2520_v54 = vmul.f32 %v4255_v1, %v4255_v1 }
0x128f   :  { %v2504_v55 = vadd.f32 %v2502_v24, %v2500_v63 }
0x1290   :  { %v4257_v37 = vpop.xlane.xlu1 %2486  ;;  %v4259_v2 = vpop.xlane.xlu0 %2480 }
0x1291   :  { %v2505_v23 = vmul.f32 0.0001, %v2504_v55  ;;  %v2539_v22 = vmul.f32 %v4257_v37, %v4259_v2  ;;  %v2525_v49 = vmul.f32 %v2523_v27, %v4257_v37  ;;  %v2530_v50 = vmul.f32 %v2523_v27, %v4259_v2 }
0x1292   :  { %v2537_v5 = vmul.f32 %v4257_v37, %v4257_v37  ;;  %v2543_v44 = vmul.f32 %v4259_v2, %v4259_v2 }
0x1293   :  { %v2506_v29 = vmul.f32 0.33333334, %v2505_v23 }
0x1294   :  { %v2660_v0 = vpop.xlane.xlu1 %2659  ;;  %v2657_v24 = vpop.xlane.xlu0 %2656 }
0x1295   :  { %v2507_v3 = vadd.f32 1e-06, %v2506_v29 }
0x1297   :  { %v2508_v39 = vadd.f32 %v2507_v3, %v4248_v60  ;;  %v2513_v52 = vrot.slane %v2507_v3, 4  ;;  %v2510_v34 = vrot.slane %v2507_v3, 6 }
0x1299   :  { %v2515_v41 = vadd.f32 %v2513_v52, %v4251_v14  ;;  %v2540_v43 = vmul.f32 %v2523_v27, %v2508_v39  ;;  %v2512_v33 = vadd.f32 %v2510_v34, %v4246_v40 }
0x129b   :  { %v2517_v28 = vrot.slane %v2515_v41, 2  ;;  %v2526_v46 = vrot.slane %v2515_v41, 4  ;;  %v2541_v42 = vsub.f32 %v2539_v22, %v2540_v43  ;;  %v2532_v47 = vrot.slane %v2512_v33, 2 }
0x129d   :  { %2600 = vperm.xlu1 %3482, %v2541_v42   ;;  %v2519_v48 = vmul.f32 %v2517_v28, %v2512_v33  ;;  %v2528_v30 = vmul.f32 %v2526_v46, %v4259_v2  ;;  %v2534_v31 = vmul.f32 %v2532_v47, %v4257_v37  ;;  %v2536_v53 = vmul.f32 %v2526_v46, %v2508_v39 }
0x129e   :  { %v2542_v13 = vmul.f32 %v2532_v47, %v2508_v39 }
0x129f   :  { %v2521_v7 = vsub.f32 %v2519_v48, %v2520_v54  ;;  %v2529_v56 = vsub.f32 %v2525_v49, %v2528_v30  ;;  %v2535_v62 = vsub.f32 %v2530_v50, %v2534_v31  ;;  %v2538_v4 = vsub.f32 %v2536_v53, %v2537_v5 }
0x12a0   :  { %v2544_v18 = vsub.f32 %v2542_v13, %v2543_v44 }
0x12a1   :  { %v2546_v57 = vrot.slane %v2521_v7, 2  ;;  %2556 = vperm.xlu1 %3482, %v2521_v7   ;;  %2562 = vperm.xlu0 %3481, %v2529_v56   ;;  %v2549_v21 = vmul.f32 %v2529_v56, %v4259_v2  ;;  %v2551_v9 = vmul.f32 %v2535_v62, %v4257_v37 }
0x12a3   :  { %v2548_v32 = vmul.f32 %v2546_v57, %v2508_v39 }
0x12a5   :  { %v2550_v6 = vadd.f32 %v2549_v21, %v2548_v32  ;;  %2572 = vperm.xlu1 %3482, %v2535_v62   ;;  %2593 = vperm.xlu0 %3481, %v2538_v4  }
0x12a7   :  { %v2552_v17 = vadd.f32 %v2551_v9, %v2550_v6 }
0x12a9   :  { %3497 = vrcp.f32 %v2552_v17  ;;  %2611 = vperm.xlu1 %3482, %v2544_v18  }
0x12b6   :  { %v3498_v19 = vpop.eup %3497 }
0x12b7   :  { %2584 = vperm.xlu0 %3481, %v3498_v19  }
0x12d6   :  { %2663 = vadd.xlane.f32.xlu0 %v2662_v12 }
0x1318   :  { %v2601_v63 = vpop.permute.xlu1 %2600 }
0x1319   :  { %v2607_v43 = vmul.f32 %v2601_v63, %v4236_v16  ;;  %v2603_v42 = vmul.f32 %v2601_v63, %v4280_v20 }
0x131c   :  { %v2557_v55 = vpop.permute.xlu1 %2556  ;;  %v2563_v23 = vpop.permute.xlu0 %2562 }
0x131d   :  { %v2565_v27 = vmul.f32 %v2563_v23, %v4236_v16  ;;  %v2590_v34 = vmul.f32 %v2563_v23, %v4229_v35  ;;  %v2559_v47 = vmul.f32 %v2557_v55, %v4224_v15 }
0x131f   :  { %v2567_v33 = vrot.slane %v2565_v27, 6 }
0x1320   :  { %v2573_v29 = vpop.permute.xlu1 %2572  ;;  %v2594_v3 = vpop.permute.xlu0 %2593 }
0x1321   :  { %v2596_v39 = vmul.f32 %v2594_v3, %v4236_v16  ;;  %v2577_v41 = vmul.f32 %v4280_v20, %v2573_v29  ;;  %v2606_v22 = vmul.f32 %v2573_v29, %v4229_v35  ;;  %v2569_v49 = vadd.f32 %v2567_v33, %v2559_v47 }
0x1323   :  { %v2597_v28 = vadd.f32 %v2596_v39, %v2590_v34  ;;  %v2579_v54 = vrot.slane %v2577_v41, 6  ;;  %v2608_v48 = vadd.f32 %v2607_v43, %v2606_v22 }
0x1324   :  { %v2612_v52 = vpop.permute.xlu1 %2611 }
0x1325   :  { %v2614_v46 = vmul.f32 %v2612_v52, %v4280_v20  ;;  %v2604_v30 = vadd.f32 %v2603_v42, %v2597_v28  ;;  %v2581_v56 = vadd.f32 %v2579_v54, %v2569_v49 }
0x1327   :  { %v2615_v31 = vadd.f32 %v2614_v46, %v2608_v48 }
0x1332   :  { %v2585_v7 = vpop.permute.xlu0 %2584 }
0x1333   :  { %v2587_v50 = vrot.slane %v2585_v7, 6  ;;  %v2605_v53 = vmul.f32 %v2604_v30, %v2585_v7  ;;  %v2616_v57 = vmul.f32 %v2615_v31, %v2585_v7 }
0x1335   :  { %v2589_v62 = vmul.f32 %v2587_v50, %v2581_v56  ;;  %v2627_v5 = vrot.slane %v2605_v53, 6  ;;  %v2635_v32 = vrot.slane %v2616_v57, 6  ;;  %v2648_v21 = vrot.slane %v2616_v57, 4 }
0x1336   :  { %v2621_v9 = vmul.f32 %v2605_v53, %v4259_v2  ;;  %v2623_v23 = vmul.f32 %v2616_v57, %v4257_v37  ;;  %v2668_v33 = vrot.slane %v2605_v53, 2  ;;  %v2672_v46 = vrot.slane %v2616_v57, 2 }
0x1337   :  { %v2618_v4 = vrot.slane %v2589_v62, 2  ;;  %v2629_v13 = vmul.f32 %v2627_v5, %v4246_v40  ;;  %v2643_v6 = vmul.f32 %v2627_v5, %v4255_v1  ;;  %v2637_v44 = vmul.f32 %v2635_v32, %v4255_v1 }
0x1338   :  { %v2650_v17 = vmul.f32 %v2648_v21, %v4251_v14  ;;  %v2665_v43 = vrot.slane %v2589_v62, 4  ;;  %v2670_v28 = vmul.f32 %v2668_v33, %v2660_v0 }
0x1339   :  { %v2620_v18 = vmul.f32 %v2618_v4, %v4248_v60  ;;  %v2625_v19 = vmul.f32 %v2618_v4, %v4259_v2  ;;  %v2631_v11 = vrot.slane %v2629_v13, 2  ;;  %v2645_v12 = vrot.slane %v2643_v6, 2 }
0x133a   :  { %v2642_v63 = vmul.f32 %v2618_v4, %v4257_v37  ;;  %v2639_v29 = vrot.slane %v2637_v44, 2  ;;  %v2652_v27 = vrot.slane %v2650_v17, 4  ;;  %v2667_v37 = vmul.f32 %v2665_v43, %v2657_v24 }
0x133b   :  { %v2622_v55 = vadd.f32 %v2621_v9, %v2620_v18  ;;  %v2633_v40 = vadd.f32 %v2631_v11, %v2625_v19 }
0x133c   :  { %v2647_v3 = vadd.f32 %v2645_v12, %v2642_v63  ;;  %v2671_v47 = vadd.f32 %v2670_v28, %v2667_v37  ;;  %v4443_v28 = vld [vmem:[#allocation3_spill] sm:$0xff] }
0x133d   :  { %v2624_v39 = vadd.f32 %v2623_v23, %v2622_v55  ;;  %v2641_v52 = vadd.f32 %v2639_v29, %v2633_v40 }
0x133e   :  { %v2654_v1 = vadd.f32 %v2652_v27, %v2647_v3 }
0x133f   :  { %v2694_v34 = vrot.slane %v2624_v39, 6  ;;  %v2697_v14 = vrot.slane %v2641_v52, 4 }
0x1340   :  { %v2700_v41 = vrot.slane %v2654_v1, 2 }
0x1341   :  { %v2708_v60 = vsel %vm1232_vm13, %v4224_v15, %v2694_v34 }
0x1342   :  { %v2709_v2 = vsel %vm748_vm8, %v2708_v60, %v2697_v14  ;;  %v4442_v14 = vld [vmem:[#allocation9_spill] sm:$0xff] }
0x1343   :  { %v2710_v22 = vsel %vm1235_vm14, %v2709_v2, %v2700_v41 }
0x135f   :  { %v2664_v42 = vpop.xlane.xlu0 %2663 }
0x1360   :  { %v2674_v54 = vmul.f32 %v2672_v46, %v2664_v42  ;;  %v4444_v42 = vld [vmem:[#allocation2_spill] sm:$0xff] }
0x1362   :  { %v2675_v48 = vadd.f32 %v2674_v54, %v2671_v47 }
0x1364   :  { %v2680_v49 = vmul.f32 %v2675_v48, %v4236_v16  ;;  %v2676_v30 = vmul.f32 %v2675_v48, %v4229_v35  ;;  %v2684_v7 = vmul.f32 %v2675_v48, %v4280_v20  ;;  %v2703_v32 = vrot.slane %v2675_v48, 6 }
0x1366   :  { %v2681_v31 = vsel %vm1178_vm12, %v2680_v49, 0.0  ;;  %v2677_v15 = vsel %vm1178_vm12, %v2676_v30, 0.0  ;;  %v2685_v24 = vsel %vm1178_vm12, %v2684_v7, 0.0 }
0x1367   :  { %2682 = vadd.xlane.f32.xlu0 %v2681_v31  ;;  %2678 = vadd.xlane.f32.xlu1 %v2677_v15 }
0x136b   :  { %2686 = vadd.xlane.f32.xlu0 %v2685_v24 }
0x13f0   :  { %v2683_v0 = vpop.xlane.xlu0 %2682  ;;  %v2679_v56 = vpop.xlane.xlu1 %2678 }
0x13f1   :  { %v2689_v50 = vmul.f32 %v2683_v0, %v2668_v33  ;;  %v2688_v53 = vmul.f32 %v2679_v56, %v2665_v43 }
0x13f3   :  { %v2690_v62 = vadd.f32 %v2689_v50, %v2688_v53 }
0x13f4   :  { %v2687_v57 = vpop.xlane.xlu0 %2686 }
0x13f5   :  { %v2691_v16 = vmul.f32 %v2687_v57, %v2672_v46 }
0x13f7   :  { %v2692_v5 = vadd.f32 %v2691_v16, %v2690_v62 }
0x13f9   :  { %v2706_v35 = vrot.slane %v2692_v5, 4 }
0x13fb   :  { %v2711_v21 = vsel %vm1232_vm13, %v2703_v32, %v2706_v35 }
0x13fc   :  { %3442 = vmatprep.subr.msk.mxu0 %vm748_vm8, %v2711_v21 }
0x13fd   :  { %3443 = vmatpush3.msk.msra.mxu0 %vm748_vm8, %v2711_v21 }
0x13fe   :  { %3444 = vmatprep.subr.mxu0 %v2710_v22 }
0x13ff   :  { %3445 = vmatpush3.msra.mxu0 %v2710_v22 }
0x1400   :  { %3447 = vmatmul.mubr.msk.f32.vlgmr.msra.gmra.mxu0 %vm730_vm7, %v4016_v25  ;;  %3456 = vmatprep.subr.mxu0 %v4039_v26 }
0x1401   :  { %3457 = vmatpush3.msra.mxu0 %v4039_v26 }
0x1402   :  { %3458 = vmatprep.subr.mxu0 %v4044_v36 }
0x1403   :  { %3459 = vmatpush3.msra.mxu0 %v4044_v36 }
0x1404   :  { %3460 = vmatprep.subr.mxu0 %v4051_v10 }
0x1405   :  { %3461 = vmatpush3.msra.mxu0 %v4051_v10 }
0x1406   :  { %3462 = vmatprep.subr.mxu0 %v4058_v59 }
0x1407   :  { %3463 = vmatpush3.msra.mxu0 %v4058_v59 }
0x14c0   :  { %v3448_v20 = vpop.f32.mrf.mxu0 }
0x14c2   :  { %v2781_v4 = vpop.f32.mrf.mxu0 }
0x14c3   :  { %3453 = vmatprep.mubr.msk.f32.mxu1 %vm141_vm1, %v2781_v4 }
0x14c4   :  { %3454 = vmatmul.mubr.msk.f32.vlgmr.msra.gmra.mxu1 %vm141_vm1, %v3448_v20 }
0x14c5   :  { %3469 = vmatprep.mubr.msk.f32.mxu1 %vm3505_vm5, %v4433_v58 }
0x1584   :  { %v3455_v25 = vpop.f32.mrf.mxu1 }
0x1585   :  { %v2868_v26 = vadd.f32 %v3455_v25, %v4067_v38 }
0x1586   :  { %v2862_v36 = vpop.f32.mrf.mxu1 }
0x1587   :  { %v2863_v13 = vadd.f32 %v4067_v38, %v2862_v36  ;;  %v552_v38 = vld [vmem:[%s4384_s13] sm:$0xff] }
0x1589   :  { %3499 = vtanh.f32 %v2863_v13 }
0x158a   :  { %3501 = vtanh.f32 %v2868_v26 }
0x1596   :  { %v3500_v10 = vpop.eup %3499 }
0x1597   :  { %v3502_v6 = vpop.eup %3501  ;;  %3464 = vmatprep.mubr.msk.f32.mxu0 %vm257_vm4, %v3500_v10 }
0x1598   :  { %3465 = vmatmul.mubr.msk.f32.vlgmr.msra.gmra.mxu0 %vm257_vm4, %v3502_v6 }
0x1658   :  { %v3466_v59 = vpop.f32.mrf.mxu0 }
0x1659   :  { %v2950_v9 = vadd.f32 %v3466_v59, %v4078_v8 }
0x165a   :  { %v2945_v44 = vpop.f32.mrf.mxu0 }
0x165b   :  { %2964 = vrot.lane.b32.xlu0 %v2950_v9, %s3511_s18  ;;  %2959 = vrot.lane.b32.xlu1 %v2950_v9, %s3507_s24  ;;  %v2954_v58 = vrot.slane %v2950_v9, 2 }
0x165f   :  { %2971 = vrot.lane.b32.xlu0 %v2950_v9, %s3510_s28  ;;  %2967 = vrot.lane.b32.xlu1 %v2954_v58, %s3507_s24 }
0x1663   :  { %555 = vperm.xlu0 %3481, %v552_v38   ;;  %2955 = vrot.lane.b32.xlu1 %v2954_v58, %s3506_s1 }
0x1667   :  { %2974 = vrot.lane.b32.xlu1 %v2954_v58, %s3511_s18 }
0x16cd   :  { %v2960_v8 = vpop.permute.xlu1 %2959  ;;  %v2965_v18 = vpop.permute.xlu0 %2964 }
0x16ce   :  { %v2963_v19 = vsel %vm727_vm6, %v2960_v8, %v2954_v58 }
0x16cf   :  { %v2979_v63 = vrot.slane %v2963_v19, 6 }
0x16d1   :  { %v2968_v17 = vpop.permute.xlu1 %2967  ;;  %v2972_v23 = vpop.permute.xlu0 %2971 }
0x16d2   :  { %v2970_v55 = vsel %vm727_vm6, %v2965_v18, %v2968_v17 }
0x16d3   :  { %v2982_v3 = vrot.slane %v2970_v55, 4 }
0x16d5   :  { %v2956_v11 = vpop.permute.xlu1 %2955 }
0x16d6   :  { %v2958_v12 = vsel %vm727_vm6, %v2950_v9, %v2956_v11 }
0x16d7   :  { %v2987_v40 = vsel %vm1232_vm13, %v2958_v12, %v2979_v63 }
0x16d8   :  { %v2988_v52 = vsel %vm748_vm8, %v2987_v40, %v2982_v3 }
0x16d9   :  { %v2975_v29 = vpop.permute.xlu1 %2974 }
0x16da   :  { %v2977_v27 = vsel %vm727_vm6, %v2972_v23, %v2975_v29 }
0x16db   :  { %v2985_v39 = vrot.slane %v2977_v27, 2 }
0x16dd   :  { %v2989_v1 = vsel %vm1235_vm14, %v2988_v52, %v2985_v39 }
0x16de   :  { %3468 = vmatpush3.msra.mxu1 %v2989_v1  ;;  %v556_v34 = vpop.permute.xlu0 %555 }
0x16df   :  { %3470 = vmatmul.mubr.msk.f32.vlgmr.msra.gmra.mxu1 %vm76_vm0, %v4129_v45  ;;  %v628_v41 = vadd.f32 %v4442_v14, %v556_v34  ;;  %v2143_v2 = vadd.f32 %v4211_v61, %v556_v34 }
0x16e1   :  { %v1738_v60 = vadd.f32 %v4143_v51, %v628_v41 }
0x16e3   :  { %v3060_v22 = vadd.f32 %v2143_v2, %v1738_v60 }
0x179f   :  { %v3056_v43 = vpop.f32.mrf.mxu1 }
0x17a0   :  { %v3061_v33 = vadd.f32 %v3060_v22, %v3056_v43 }
0x17a1   :  { %v3471_v37 = vpop.f32.mrf.mxu1 }
0x17a2   :  { %v3062_v46 = vmul.f32 %v3061_v33, %v4443_v28 }
0x17a4   :  { %v3063_v47 = vadd.f32 %v3062_v46, %v4444_v42 }
0x17a6   :  { %3064 = vst.msk [vmem:[%s4385_s23] sm:$0xff] %vm76_vm0, %v3063_v47 }

</bundles_post_ra>
